<compile_context>
chip_gen: v6e
topology: v6e:2x2x1
jax: 0.10.0
libtpu: 0.0.40
codegen_flags: <defaults>
</compile_context>

<pallas_src>
import jax
import jax.numpy as jnp
from jax.experimental import pallas as pl
from jax.experimental.pallas import tpu as pltpu

LATENT_DIM = 32
DEC_IN_C = 512                   # fc output channels / decoder input channels
DEC_OUT_C = 3                    # stand-in decoder output channels
H = W = 8
HW = H * W                       # 64
FC_OUT = DEC_IN_C * HW           # 512 * 8 * 8 = 32768
FUSED = LATENT_DIM * HW          # 32 * 64 = 2048 (latent x spatial, fused)


# ---------------------------------------------------------------------------
# Fused kernel.
#
# Grid axis j tiles the 512 decoder-input channels.  Per step:
#   part[oc, l*64+hw] = sum_{c in tile} dec_w[c, oc] * fc_w[l, c*64+hw]   (MXU)
# accumulated in a (3, 2048) f32 scratch.  On the last step z is sampled and
# applied to the folded effective weight, the folded bias is added, tanh'ed and
# the (B, 3, 64) NCHW-ordered output is stored.
# ---------------------------------------------------------------------------
def _fused_kernel(mean_ref, std_ref, eps1_ref, eps2_ref, w_ref, dect_ref,
                  beff_ref, o_ref, acc_ref):
    j = pl.program_id(0)

    # MXU: fold the decoder's 1x1-conv channel contraction into this fc weight
    # tile.  dect block: (3, nc) bf16; w block: (nc, 2048) bf16; f32 accumulate.
    part = jnp.dot(dect_ref[...], w_ref[...],
                   preferred_element_type=jnp.float32)          # (3, 2048) f32

    @pl.when(j == 0)
    def _init():
        acc_ref[...] = part

    @pl.when(j > 0)
    def _accumulate():
        acc_ref[...] = acc_ref[...] + part

    @pl.when(j == pl.num_programs(0) - 1)
    def _finalize():
        batch, latent = eps1_ref.shape
        oc, hw = beff_ref.shape

        # z = mean + eps1 * std + 0.1 * eps2          (B, L) f32
        z = mean_ref[...] + eps1_ref[...] * std_ref[...] + 0.1 * eps2_ref[...]

        weff = acc_ref[...]                            # (3, L*HW) f32, 24 KiB
        # Apply z to the folded effective weight: tiny one-time loop of static
        # 64-lane slices + broadcast FMAs (a few hundred VPU ops total).
        y = jnp.zeros((batch, oc, hw), jnp.float32)
        for l in range(latent):                        # static, 32 iterations
            w_l = weff[:, l * hw:(l + 1) * hw]         # (3, 64)
            z_l = z[:, l:l + 1][:, :, None]            # (B, 1, 1)
            y = y + z_l * w_l[None, :, :]              # (B, 3, 64)

        o_ref[...] = jnp.tanh(y + beff_ref[...][None, :, :])


def fused_generator_forward(mean, std, eps1, eps2, wh, dect, beff, *,
                            num_tiles=2):
    """mean/std: (1, L) f32; eps1/eps2: (B, L) f32;
       wh: (C, L*HW) bf16 with wh[c, l*HW+hw] = fc_w[l, c*HW+hw];
       dect: (3, C) bf16 (decoder weight, transposed); beff: (3, HW) f32."""
    B, L = eps1.shape
    C, F = wh.shape
    assert C % num_tiles == 0
    nc = C // num_tiles

    return pl.pallas_call(
        _fused_kernel,
        out_shape=jax.ShapeDtypeStruct((B, DEC_OUT_C, HW), jnp.float32),
        grid_spec=pltpu.PrefetchScalarGridSpec(
            num_scalar_prefetch=0,
            grid=(num_tiles,),
            in_specs=[
                pl.BlockSpec((1, L), lambda j: (0, 0)),            # mean
                pl.BlockSpec((1, L), lambda j: (0, 0)),            # std
                pl.BlockSpec((B, L), lambda j: (0, 0)),            # eps1
                pl.BlockSpec((B, L), lambda j: (0, 0)),            # eps2
                pl.BlockSpec((nc, F), lambda j: (j, 0)),           # fc W tile (bf16)
                pl.BlockSpec((DEC_OUT_C, nc), lambda j: (0, j)),   # dec W^T tile (bf16)
                pl.BlockSpec((DEC_OUT_C, HW), lambda j: (0, 0)),   # folded bias (f32)
            ],
            out_specs=pl.BlockSpec((B, DEC_OUT_C, HW), lambda j: (0, 0, 0)),
            scratch_shapes=[pltpu.VMEM((DEC_OUT_C, F), jnp.float32)],
        ),
        compiler_params=pltpu.CompilerParams(
            # the grid axis carries the folded-weight accumulator -> "arbitrary"
            dimension_semantics=("arbitrary",),
        ),
    )(mean, std, eps1, eps2, wh, dect, beff)


# ---------------------------------------------------------------------------
# Module wrapper (parameter setup / glue in plain JAX)
# ---------------------------------------------------------------------------
class AEGeneratorPallas:
    """AEGenerator with the whole forward fused into one Pallas TPU kernel."""

    def __init__(self, key, latent_dim, dataset_mean, dataset_std):
        k1, k2, k3, k4 = jax.random.split(key, 4)
        self.latent_dim = latent_dim
        self.dataset_mean = jnp.asarray(dataset_mean, jnp.float32).reshape(1, latent_dim)
        self.dataset_std = jnp.asarray(dataset_std, jnp.float32).reshape(1, latent_dim)

        # nn.Linear(latent_dim, 512*8*8): uniform(-1/sqrt(fan_in), 1/sqrt(fan_in))
        bound = 1.0 / (latent_dim ** 0.5)
        fc_w = jax.random.uniform(k1, (latent_dim, FC_OUT), jnp.float32, -bound, bound)
        fc_b = jax.random.uniform(k2, (FC_OUT,), jnp.float32, -bound, bound)

        # synthetic stand-in decoder params (1x1 conv 512 -> 3, tanh)
        dbound = 1.0 / (DEC_IN_C ** 0.5)
        dec_w = jax.random.uniform(k3, (DEC_IN_C, DEC_OUT_C), jnp.float32, -dbound, dbound)
        dec_b = jax.random.uniform(k4, (DEC_OUT_C,), jnp.float32, -dbound, dbound)

        # --- kernel-side parameter layouts ---------------------------------
        # fc weight with channels on rows and (latent, spatial) fused on columns:
        #   wh[c, l*HW + hw] = fc_w[l, c*HW + hw]      (bf16, halves HBM traffic)
        self.wh = (fc_w.reshape(latent_dim, DEC_IN_C, HW)
                   .transpose(1, 0, 2)
                   .reshape(DEC_IN_C, latent_dim * HW)
                   .astype(jnp.bfloat16))
        # decoder weight transposed (3, 512) bf16 - the MXU lhs of the fold
        self.dect = dec_w.T.astype(jnp.bfloat16)
        # fc bias folded through the linear decoder (host-side, review item 3):
        #   beff[oc, hw] = dec_b[oc] + sum_c fc_b[c*HW+hw] * dec_w[c, oc]
        dec_w_r = self.dect.astype(jnp.float32).T            # bf16-rounded, (C, 3)
        self.beff = (dec_b[:, None]
                     + jnp.einsum('ch,co->oh', fc_b.reshape(DEC_IN_C, HW), dec_w_r))

        # f32 copies (with the same bf16 rounding) for the pure-JAX reference
        self._fc_w_ref = (self.wh.astype(jnp.float32)
                          .reshape(DEC_IN_C, latent_dim, HW)
                          .transpose(1, 0, 2)
                          .reshape(latent_dim, FC_OUT))
        self._fc_b_ref = fc_b
        self._dec_w_ref = dec_w_r
        self._dec_b_ref = dec_b

    def _sample_eps(self, key, batch_size):
        k1, k2 = jax.random.split(key)
        eps1 = jax.random.normal(k1, (batch_size, self.latent_dim), jnp.float32)
        eps2 = jax.random.normal(k2, (batch_size, self.latent_dim), jnp.float32)
        return eps1, eps2

    def forward(self, key, batch_size):
        eps1, eps2 = self._sample_eps(key, batch_size)
        flat = fused_generator_forward(self.dataset_mean, self.dataset_std,
                                       eps1, eps2, self.wh, self.dect, self.beff)
        # rows already NCHW-ordered: pure reshape, no transpose
        return flat.reshape(batch_size, DEC_OUT_C, H, W)

    def reference(self, key, batch_size):
        """Unfused module-form forward: z -> fc -> view(B,512,8,8) -> 1x1conv -> tanh."""
        eps1, eps2 = self._sample_eps(key, batch_size)
        z = self.dataset_mean + eps1 * self.dataset_std + 0.1 * eps2
        h = z @ self._fc_w_ref + self._fc_b_ref
        x = h.reshape(batch_size, DEC_IN_C, H, W)
        y = (jnp.einsum('bchw,co->bohw', x, self._dec_w_ref)
             + self._dec_b_ref.reshape(1, DEC_OUT_C, 1, 1))
        return jnp.tanh(y)


if __name__ == "__main__":
    root = jax.random.PRNGKey(0)
    k_params, k_stats, k_fwd = jax.random.split(root, 3)

    # deterministic dataset statistics (latent_dim,)
    ks1, ks2 = jax.random.split(k_stats)
    dataset_mean = jax.random.normal(ks1, (LATENT_DIM,), jnp.float32)
    dataset_std = jnp.abs(jax.random.normal(ks2, (LATENT_DIM,), jnp.float32)) + 0.5

    gen = AEGeneratorPallas(k_params, LATENT_DIM, dataset_mean, dataset_std)

    batch_size = 2
    fwd = jax.jit(lambda k: gen.forward(k, batch_size))
    out = jax.block_until_ready(fwd(k_fwd))

    assert out.shape == (batch_size, DEC_OUT_C, H, W), out.shape
    assert out.dtype == jnp.float32
    assert bool(jnp.all(jnp.isfinite(out)))

    # numerical check against the unfused module-form reference
    ref = gen.reference(k_fwd, batch_size)
    max_err = float(jnp.max(jnp.abs(out - ref)))
    assert max_err < 5e-3, f"kernel/reference mismatch: {max_err}"

    print("KERNEL_OK")
</pallas_src>

<mosaic_0001>
module attributes {stable_mosaic.version = 11 : i64} {
  func.func @_fused_kernel(%arg0: i32, %arg1: memref<1x32xf32, #tpu.memory_space<vmem>>, %arg2: memref<1x32xf32, #tpu.memory_space<vmem>>, %arg3: memref<2x32xf32, #tpu.memory_space<vmem>>, %arg4: memref<2x32xf32, #tpu.memory_space<vmem>>, %arg5: memref<256x2048xbf16, #tpu.memory_space<vmem>>, %arg6: memref<3x256xbf16, #tpu.memory_space<vmem>>, %arg7: memref<3x64xf32, #tpu.memory_space<vmem>>, %arg8: memref<2x3x64xf32, #tpu.memory_space<vmem>>, %arg9: memref<3x2048xf32, #tpu.memory_space<vmem>>) attributes {dimension_semantics = [#tpu.dimension_semantics<arbitrary>], iteration_bounds = array<i64: 2>, scalar_prefetch = 0 : i64, scratch_operands = 1 : i64, tpu.core_type = #tpu.core_type<tc>, window_params = [{pipeline_mode = #tpu.pipeline_mode<synchronous>, transform_indices = @transform_0, window_bounds = array<i64: 1, 32>}, {pipeline_mode = #tpu.pipeline_mode<synchronous>, transform_indices = @transform_1, window_bounds = array<i64: 1, 32>}, {pipeline_mode = #tpu.pipeline_mode<synchronous>, transform_indices = @transform_2, window_bounds = array<i64: 2, 32>}, {pipeline_mode = #tpu.pipeline_mode<synchronous>, transform_indices = @transform_3, window_bounds = array<i64: 2, 32>}, {transform_indices = @transform_4, window_bounds = array<i64: 256, 2048>}, {transform_indices = @transform_5, window_bounds = array<i64: 3, 256>}, {pipeline_mode = #tpu.pipeline_mode<synchronous>, transform_indices = @transform_6, window_bounds = array<i64: 3, 64>}, {pipeline_mode = #tpu.pipeline_mode<synchronous>, transform_indices = @transform_7, window_bounds = array<i64: 2, 3, 64>}]} {
    %c0 = arith.constant 0 : index
    %c0_0 = arith.constant 0 : index
    %0 = vector.load %arg6[%c0, %c0_0] : memref<3x256xbf16, #tpu.memory_space<vmem>>, vector<3x256xbf16>
    %c0_1 = arith.constant 0 : index
    %c0_2 = arith.constant 0 : index
    %1 = vector.load %arg5[%c0_1, %c0_2] : memref<256x2048xbf16, #tpu.memory_space<vmem>>, vector<256x2048xbf16>
    %cst = arith.constant dense<0.000000e+00> : vector<3x2048xf32>
    %2 = tpu.matmul %0, %1, %cst {dimension_numbers = #tpu.dot_dimension_numbers<[1], [0], [0], [1], [0, 0, 1, 1], [], []>} : vector<3x256xbf16>, vector<256x2048xbf16>, vector<3x2048xf32> -> vector<3x2048xf32>
    %c0_i32 = arith.constant 0 : i32
    %3 = arith.cmpi eq, %arg0, %c0_i32 : i32
    %4 = arith.extui %3 : i1 to i32
    %c0_i32_3 = arith.constant 0 : i32
    %5 = arith.cmpi ne, %4, %c0_i32_3 : i32
    scf.if %5 {
      %c0_7 = arith.constant 0 : index
      %c0_8 = arith.constant 0 : index
      %12 = vector.load %arg9[%c0_7, %c0_8] : memref<3x2048xf32, #tpu.memory_space<vmem>>, vector<3x2048xf32>
      tpu.vector_store %arg9[%c0_7, %c0_8], %2 {strides = array<i32>} : memref<3x2048xf32, #tpu.memory_space<vmem>>, vector<3x2048xf32>,
    } else {
    }
    %c0_i32_4 = arith.constant 0 : i32
    %6 = arith.cmpi sgt, %arg0, %c0_i32_4 : i32
    %7 = arith.extui %6 : i1 to i32
    %c0_i32_5 = arith.constant 0 : i32
    %8 = arith.cmpi ne, %7, %c0_i32_5 : i32
    scf.if %8 {
      %c0_7 = arith.constant 0 : index
      %c0_8 = arith.constant 0 : index
      %12 = vector.load %arg9[%c0_7, %c0_8] : memref<3x2048xf32, #tpu.memory_space<vmem>>, vector<3x2048xf32>
      %13 = arith.addf %12, %2 : vector<3x2048xf32>
      %c0_9 = arith.constant 0 : index
      %c0_10 = arith.constant 0 : index
      %14 = vector.load %arg9[%c0_9, %c0_10] : memref<3x2048xf32, #tpu.memory_space<vmem>>, vector<3x2048xf32>
      tpu.vector_store %arg9[%c0_9, %c0_10], %13 {strides = array<i32>} : memref<3x2048xf32, #tpu.memory_space<vmem>>, vector<3x2048xf32>,
    } else {
    }
    %c1_i32 = arith.constant 1 : i32
    %9 = arith.cmpi eq, %arg0, %c1_i32 : i32
    %10 = arith.extui %9 : i1 to i32
    %c0_i32_6 = arith.constant 0 : i32
    %11 = arith.cmpi ne, %10, %c0_i32_6 : i32
    scf.if %11 {
      %c0_7 = arith.constant 0 : index
      %c0_8 = arith.constant 0 : index
      %12 = vector.load %arg1[%c0_7, %c0_8] : memref<1x32xf32, #tpu.memory_space<vmem>>, vector<1x32xf32>
      %c0_9 = arith.constant 0 : index
      %c0_10 = arith.constant 0 : index
      %13 = vector.load %arg3[%c0_9, %c0_10] : memref<2x32xf32, #tpu.memory_space<vmem>>, vector<2x32xf32>
      %c0_11 = arith.constant 0 : index
      %c0_12 = arith.constant 0 : index
      %14 = vector.load %arg2[%c0_11, %c0_12] : memref<1x32xf32, #tpu.memory_space<vmem>>, vector<1x32xf32>
      %15 = vector.broadcast %14 : vector<1x32xf32> to vector<2x32xf32>
      %16 = arith.mulf %13, %15 : vector<2x32xf32>
      %17 = vector.broadcast %12 : vector<1x32xf32> to vector<2x32xf32>
      %18 = arith.addf %17, %16 : vector<2x32xf32>
      %c0_13 = arith.constant 0 : index
      %c0_14 = arith.constant 0 : index
      %19 = vector.load %arg4[%c0_13, %c0_14] : memref<2x32xf32, #tpu.memory_space<vmem>>, vector<2x32xf32>
      %cst_15 = arith.constant 1.000000e-01 : f32
      %20 = vector.broadcast %cst_15 : f32 to vector<2x32xf32>
      %21 = arith.mulf %20, %19 : vector<2x32xf32>
      %22 = arith.addf %18, %21 : vector<2x32xf32>
      %c0_16 = arith.constant 0 : index
      %c0_17 = arith.constant 0 : index
      %23 = vector.load %arg9[%c0_16, %c0_17] : memref<3x2048xf32, #tpu.memory_space<vmem>>, vector<3x2048xf32>
      %cst_18 = arith.constant 0.000000e+00 : f32
      %24 = vector.broadcast %cst_18 : f32 to vector<2x3x64xf32>
      %25 = vector.extract_strided_slice %23 {offsets = [0, 0], sizes = [3, 64], strides = [1, 1]} : vector<3x2048xf32> to vector<3x64xf32>
      %26 = vector.extract_strided_slice %22 {offsets = [0, 0], sizes = [2, 1], strides = [1, 1]} : vector<2x32xf32> to vector<2x1xf32>
      %27 = vector.shape_cast %26 : vector<2x1xf32> to vector<2x1x1xf32>
      %28 = vector.shape_cast %25 : vector<3x64xf32> to vector<1x3x64xf32>
      %29 = vector.broadcast %27 : vector<2x1x1xf32> to vector<2x3x64xf32>
      %30 = vector.broadcast %28 : vector<1x3x64xf32> to vector<2x3x64xf32>
      %31 = arith.mulf %29, %30 : vector<2x3x64xf32>
      %32 = arith.addf %24, %31 : vector<2x3x64xf32>
      %33 = vector.extract_strided_slice %23 {offsets = [0, 64], sizes = [3, 64], strides = [1, 1]} : vector<3x2048xf32> to vector<3x64xf32>
      %34 = vector.extract_strided_slice %22 {offsets = [0, 1], sizes = [2, 1], strides = [1, 1]} : vector<2x32xf32> to vector<2x1xf32>
      %35 = vector.shape_cast %34 : vector<2x1xf32> to vector<2x1x1xf32>
      %36 = vector.shape_cast %33 : vector<3x64xf32> to vector<1x3x64xf32>
      %37 = vector.broadcast %35 : vector<2x1x1xf32> to vector<2x3x64xf32>
      %38 = vector.broadcast %36 : vector<1x3x64xf32> to vector<2x3x64xf32>
      %39 = arith.mulf %37, %38 : vector<2x3x64xf32>
      %40 = arith.addf %32, %39 : vector<2x3x64xf32>
      %41 = vector.extract_strided_slice %23 {offsets = [0, 128], sizes = [3, 64], strides = [1, 1]} : vector<3x2048xf32> to vector<3x64xf32>
      %42 = vector.extract_strided_slice %22 {offsets = [0, 2], sizes = [2, 1], strides = [1, 1]} : vector<2x32xf32> to vector<2x1xf32>
      %43 = vector.shape_cast %42 : vector<2x1xf32> to vector<2x1x1xf32>
      %44 = vector.shape_cast %41 : vector<3x64xf32> to vector<1x3x64xf32>
      %45 = vector.broadcast %43 : vector<2x1x1xf32> to vector<2x3x64xf32>
      %46 = vector.broadcast %44 : vector<1x3x64xf32> to vector<2x3x64xf32>
      %47 = arith.mulf %45, %46 : vector<2x3x64xf32>
      %48 = arith.addf %40, %47 : vector<2x3x64xf32>
      %49 = vector.extract_strided_slice %23 {offsets = [0, 192], sizes = [3, 64], strides = [1, 1]} : vector<3x2048xf32> to vector<3x64xf32>
      %50 = vector.extract_strided_slice %22 {offsets = [0, 3], sizes = [2, 1], strides = [1, 1]} : vector<2x32xf32> to vector<2x1xf32>
      %51 = vector.shape_cast %50 : vector<2x1xf32> to vector<2x1x1xf32>
      %52 = vector.shape_cast %49 : vector<3x64xf32> to vector<1x3x64xf32>
      %53 = vector.broadcast %51 : vector<2x1x1xf32> to vector<2x3x64xf32>
      %54 = vector.broadcast %52 : vector<1x3x64xf32> to vector<2x3x64xf32>
      %55 = arith.mulf %53, %54 : vector<2x3x64xf32>
      %56 = arith.addf %48, %55 : vector<2x3x64xf32>
      %57 = vector.extract_strided_slice %23 {offsets = [0, 256], sizes = [3, 64], strides = [1, 1]} : vector<3x2048xf32> to vector<3x64xf32>
      %58 = vector.extract_strided_slice %22 {offsets = [0, 4], sizes = [2, 1], strides = [1, 1]} : vector<2x32xf32> to vector<2x1xf32>
      %59 = vector.shape_cast %58 : vector<2x1xf32> to vector<2x1x1xf32>
      %60 = vector.shape_cast %57 : vector<3x64xf32> to vector<1x3x64xf32>
      %61 = vector.broadcast %59 : vector<2x1x1xf32> to vector<2x3x64xf32>
      %62 = vector.broadcast %60 : vector<1x3x64xf32> to vector<2x3x64xf32>
      %63 = arith.mulf %61, %62 : vector<2x3x64xf32>
      %64 = arith.addf %56, %63 : vector<2x3x64xf32>
      %65 = vector.extract_strided_slice %23 {offsets = [0, 320], sizes = [3, 64], strides = [1, 1]} : vector<3x2048xf32> to vector<3x64xf32>
      %66 = vector.extract_strided_slice %22 {offsets = [0, 5], sizes = [2, 1], strides = [1, 1]} : vector<2x32xf32> to vector<2x1xf32>
      %67 = vector.shape_cast %66 : vector<2x1xf32> to vector<2x1x1xf32>
      %68 = vector.shape_cast %65 : vector<3x64xf32> to vector<1x3x64xf32>
      %69 = vector.broadcast %67 : vector<2x1x1xf32> to vector<2x3x64xf32>
      %70 = vector.broadcast %68 : vector<1x3x64xf32> to vector<2x3x64xf32>
      %71 = arith.mulf %69, %70 : vector<2x3x64xf32>
      %72 = arith.addf %64, %71 : vector<2x3x64xf32>
      %73 = vector.extract_strided_slice %23 {offsets = [0, 384], sizes = [3, 64], strides = [1, 1]} : vector<3x2048xf32> to vector<3x64xf32>
      %74 = vector.extract_strided_slice %22 {offsets = [0, 6], sizes = [2, 1], strides = [1, 1]} : vector<2x32xf32> to vector<2x1xf32>
      %75 = vector.shape_cast %74 : vector<2x1xf32> to vector<2x1x1xf32>
      %76 = vector.shape_cast %73 : vector<3x64xf32> to vector<1x3x64xf32>
      %77 = vector.broadcast %75 : vector<2x1x1xf32> to vector<2x3x64xf32>
      %78 = vector.broadcast %76 : vector<1x3x64xf32> to vector<2x3x64xf32>
      %79 = arith.mulf %77, %78 : vector<2x3x64xf32>
      %80 = arith.addf %72, %79 : vector<2x3x64xf32>
      %81 = vector.extract_strided_slice %23 {offsets = [0, 448], sizes = [3, 64], strides = [1, 1]} : vector<3x2048xf32> to vector<3x64xf32>
      %82 = vector.extract_strided_slice %22 {offsets = [0, 7], sizes = [2, 1], strides = [1, 1]} : vector<2x32xf32> to vector<2x1xf32>
      %83 = vector.shape_cast %82 : vector<2x1xf32> to vector<2x1x1xf32>
      %84 = vector.shape_cast %81 : vector<3x64xf32> to vector<1x3x64xf32>
      %85 = vector.broadcast %83 : vector<2x1x1xf32> to vector<2x3x64xf32>
      %86 = vector.broadcast %84 : vector<1x3x64xf32> to vector<2x3x64xf32>
      %87 = arith.mulf %85, %86 : vector<2x3x64xf32>
      %88 = arith.addf %80, %87 : vector<2x3x64xf32>
      %89 = vector.extract_strided_slice %23 {offsets = [0, 512], sizes = [3, 64], strides = [1, 1]} : vector<3x2048xf32> to vector<3x64xf32>
      %90 = vector.extract_strided_slice %22 {offsets = [0, 8], sizes = [2, 1], strides = [1, 1]} : vector<2x32xf32> to vector<2x1xf32>
      %91 = vector.shape_cast %90 : vector<2x1xf32> to vector<2x1x1xf32>
      %92 = vector.shape_cast %89 : vector<3x64xf32> to vector<1x3x64xf32>
      %93 = vector.broadcast %91 : vector<2x1x1xf32> to vector<2x3x64xf32>
      %94 = vector.broadcast %92 : vector<1x3x64xf32> to vector<2x3x64xf32>
      %95 = arith.mulf %93, %94 : vector<2x3x64xf32>
      %96 = arith.addf %88, %95 : vector<2x3x64xf32>
      %97 = vector.extract_strided_slice %23 {offsets = [0, 576], sizes = [3, 64], strides = [1, 1]} : vector<3x2048xf32> to vector<3x64xf32>
      %98 = vector.extract_strided_slice %22 {offsets = [0, 9], sizes = [2, 1], strides = [1, 1]} : vector<2x32xf32> to vector<2x1xf32>
      %99 = vector.shape_cast %98 : vector<2x1xf32> to vector<2x1x1xf32>
      %100 = vector.shape_cast %97 : vector<3x64xf32> to vector<1x3x64xf32>
      %101 = vector.broadcast %99 : vector<2x1x1xf32> to vector<2x3x64xf32>
      %102 = vector.broadcast %100 : vector<1x3x64xf32> to vector<2x3x64xf32>
      %103 = arith.mulf %101, %102 : vector<2x3x64xf32>
      %104 = arith.addf %96, %103 : vector<2x3x64xf32>
      %105 = vector.extract_strided_slice %23 {offsets = [0, 640], sizes = [3, 64], strides = [1, 1]} : vector<3x2048xf32> to vector<3x64xf32>
      %106 = vector.extract_strided_slice %22 {offsets = [0, 10], sizes = [2, 1], strides = [1, 1]} : vector<2x32xf32> to vector<2x1xf32>
      %107 = vector.shape_cast %106 : vector<2x1xf32> to vector<2x1x1xf32>
      %108 = vector.shape_cast %105 : vector<3x64xf32> to vector<1x3x64xf32>
      %109 = vector.broadcast %107 : vector<2x1x1xf32> to vector<2x3x64xf32>
      %110 = vector.broadcast %108 : vector<1x3x64xf32> to vector<2x3x64xf32>
      %111 = arith.mulf %109, %110 : vector<2x3x64xf32>
      %112 = arith.addf %104, %111 : vector<2x3x64xf32>
      %113 = vector.extract_strided_slice %23 {offsets = [0, 704], sizes = [3, 64], strides = [1, 1]} : vector<3x2048xf32> to vector<3x64xf32>
      %114 = vector.extract_strided_slice %22 {offsets = [0, 11], sizes = [2, 1], strides = [1, 1]} : vector<2x32xf32> to vector<2x1xf32>
      %115 = vector.shape_cast %114 : vector<2x1xf32> to vector<2x1x1xf32>
      %116 = vector.shape_cast %113 : vector<3x64xf32> to vector<1x3x64xf32>
      %117 = vector.broadcast %115 : vector<2x1x1xf32> to vector<2x3x64xf32>
      %118 = vector.broadcast %116 : vector<1x3x64xf32> to vector<2x3x64xf32>
      %119 = arith.mulf %117, %118 : vector<2x3x64xf32>
      %120 = arith.addf %112, %119 : vector<2x3x64xf32>
      %121 = vector.extract_strided_slice %23 {offsets = [0, 768], sizes = [3, 64], strides = [1, 1]} : vector<3x2048xf32> to vector<3x64xf32>
      %122 = vector.extract_strided_slice %22 {offsets = [0, 12], sizes = [2, 1], strides = [1, 1]} : vector<2x32xf32> to vector<2x1xf32>
      %123 = vector.shape_cast %122 : vector<2x1xf32> to vector<2x1x1xf32>
      %124 = vector.shape_cast %121 : vector<3x64xf32> to vector<1x3x64xf32>
      %125 = vector.broadcast %123 : vector<2x1x1xf32> to vector<2x3x64xf32>
      %126 = vector.broadcast %124 : vector<1x3x64xf32> to vector<2x3x64xf32>
      %127 = arith.mulf %125, %126 : vector<2x3x64xf32>
      %128 = arith.addf %120, %127 : vector<2x3x64xf32>
      %129 = vector.extract_strided_slice %23 {offsets = [0, 832], sizes = [3, 64], strides = [1, 1]} : vector<3x2048xf32> to vector<3x64xf32>
      %130 = vector.extract_strided_slice %22 {offsets = [0, 13], sizes = [2, 1], strides = [1, 1]} : vector<2x32xf32> to vector<2x1xf32>
      %131 = vector.shape_cast %130 : vector<2x1xf32> to vector<2x1x1xf32>
      %132 = vector.shape_cast %129 : vector<3x64xf32> to vector<1x3x64xf32>
      %133 = vector.broadcast %131 : vector<2x1x1xf32> to vector<2x3x64xf32>
      %134 = vector.broadcast %132 : vector<1x3x64xf32> to vector<2x3x64xf32>
      %135 = arith.mulf %133, %134 : vector<2x3x64xf32>
      %136 = arith.addf %128, %135 : vector<2x3x64xf32>
      %137 = vector.extract_strided_slice %23 {offsets = [0, 896], sizes = [3, 64], strides = [1, 1]} : vector<3x2048xf32> to vector<3x64xf32>
      %138 = vector.extract_strided_slice %22 {offsets = [0, 14], sizes = [2, 1], strides = [1, 1]} : vector<2x32xf32> to vector<2x1xf32>
      %139 = vector.shape_cast %138 : vector<2x1xf32> to vector<2x1x1xf32>
      %140 = vector.shape_cast %137 : vector<3x64xf32> to vector<1x3x64xf32>
      %141 = vector.broadcast %139 : vector<2x1x1xf32> to vector<2x3x64xf32>
      %142 = vector.broadcast %140 : vector<1x3x64xf32> to vector<2x3x64xf32>
      %143 = arith.mulf %141, %142 : vector<2x3x64xf32>
      %144 = arith.addf %136, %143 : vector<2x3x64xf32>
      %145 = vector.extract_strided_slice %23 {offsets = [0, 960], sizes = [3, 64], strides = [1, 1]} : vector<3x2048xf32> to vector<3x64xf32>
      %146 = vector.extract_strided_slice %22 {offsets = [0, 15], sizes = [2, 1], strides = [1, 1]} : vector<2x32xf32> to vector<2x1xf32>
      %147 = vector.shape_cast %146 : vector<2x1xf32> to vector<2x1x1xf32>
      %148 = vector.shape_cast %145 : vector<3x64xf32> to vector<1x3x64xf32>
      %149 = vector.broadcast %147 : vector<2x1x1xf32> to vector<2x3x64xf32>
      %150 = vector.broadcast %148 : vector<1x3x64xf32> to vector<2x3x64xf32>
      %151 = arith.mulf %149, %150 : vector<2x3x64xf32>
      %152 = arith.addf %144, %151 : vector<2x3x64xf32>
      %153 = vector.extract_strided_slice %23 {offsets = [0, 1024], sizes = [3, 64], strides = [1, 1]} : vector<3x2048xf32> to vector<3x64xf32>
      %154 = vector.extract_strided_slice %22 {offsets = [0, 16], sizes = [2, 1], strides = [1, 1]} : vector<2x32xf32> to vector<2x1xf32>
      %155 = vector.shape_cast %154 : vector<2x1xf32> to vector<2x1x1xf32>
      %156 = vector.shape_cast %153 : vector<3x64xf32> to vector<1x3x64xf32>
      %157 = vector.broadcast %155 : vector<2x1x1xf32> to vector<2x3x64xf32>
      %158 = vector.broadcast %156 : vector<1x3x64xf32> to vector<2x3x64xf32>
      %159 = arith.mulf %157, %158 : vector<2x3x64xf32>
      %160 = arith.addf %152, %159 : vector<2x3x64xf32>
      %161 = vector.extract_strided_slice %23 {offsets = [0, 1088], sizes = [3, 64], strides = [1, 1]} : vector<3x2048xf32> to vector<3x64xf32>
      %162 = vector.extract_strided_slice %22 {offsets = [0, 17], sizes = [2, 1], strides = [1, 1]} : vector<2x32xf32> to vector<2x1xf32>
      %163 = vector.shape_cast %162 : vector<2x1xf32> to vector<2x1x1xf32>
      %164 = vector.shape_cast %161 : vector<3x64xf32> to vector<1x3x64xf32>
      %165 = vector.broadcast %163 : vector<2x1x1xf32> to vector<2x3x64xf32>
      %166 = vector.broadcast %164 : vector<1x3x64xf32> to vector<2x3x64xf32>
      %167 = arith.mulf %165, %166 : vector<2x3x64xf32>
      %168 = arith.addf %160, %167 : vector<2x3x64xf32>
      %169 = vector.extract_strided_slice %23 {offsets = [0, 1152], sizes = [3, 64], strides = [1, 1]} : vector<3x2048xf32> to vector<3x64xf32>
      %170 = vector.extract_strided_slice %22 {offsets = [0, 18], sizes = [2, 1], strides = [1, 1]} : vector<2x32xf32> to vector<2x1xf32>
      %171 = vector.shape_cast %170 : vector<2x1xf32> to vector<2x1x1xf32>
      %172 = vector.shape_cast %169 : vector<3x64xf32> to vector<1x3x64xf32>
      %173 = vector.broadcast %171 : vector<2x1x1xf32> to vector<2x3x64xf32>
      %174 = vector.broadcast %172 : vector<1x3x64xf32> to vector<2x3x64xf32>
      %175 = arith.mulf %173, %174 : vector<2x3x64xf32>
      %176 = arith.addf %168, %175 : vector<2x3x64xf32>
      %177 = vector.extract_strided_slice %23 {offsets = [0, 1216], sizes = [3, 64], strides = [1, 1]} : vector<3x2048xf32> to vector<3x64xf32>
      %178 = vector.extract_strided_slice %22 {offsets = [0, 19], sizes = [2, 1], strides = [1, 1]} : vector<2x32xf32> to vector<2x1xf32>
      %179 = vector.shape_cast %178 : vector<2x1xf32> to vector<2x1x1xf32>
      %180 = vector.shape_cast %177 : vector<3x64xf32> to vector<1x3x64xf32>
      %181 = vector.broadcast %179 : vector<2x1x1xf32> to vector<2x3x64xf32>
      %182 = vector.broadcast %180 : vector<1x3x64xf32> to vector<2x3x64xf32>
      %183 = arith.mulf %181, %182 : vector<2x3x64xf32>
      %184 = arith.addf %176, %183 : vector<2x3x64xf32>
      %185 = vector.extract_strided_slice %23 {offsets = [0, 1280], sizes = [3, 64], strides = [1, 1]} : vector<3x2048xf32> to vector<3x64xf32>
      %186 = vector.extract_strided_slice %22 {offsets = [0, 20], sizes = [2, 1], strides = [1, 1]} : vector<2x32xf32> to vector<2x1xf32>
      %187 = vector.shape_cast %186 : vector<2x1xf32> to vector<2x1x1xf32>
      %188 = vector.shape_cast %185 : vector<3x64xf32> to vector<1x3x64xf32>
      %189 = vector.broadcast %187 : vector<2x1x1xf32> to vector<2x3x64xf32>
      %190 = vector.broadcast %188 : vector<1x3x64xf32> to vector<2x3x64xf32>
      %191 = arith.mulf %189, %190 : vector<2x3x64xf32>
      %192 = arith.addf %184, %191 : vector<2x3x64xf32>
      %193 = vector.extract_strided_slice %23 {offsets = [0, 1344], sizes = [3, 64], strides = [1, 1]} : vector<3x2048xf32> to vector<3x64xf32>
      %194 = vector.extract_strided_slice %22 {offsets = [0, 21], sizes = [2, 1], strides = [1, 1]} : vector<2x32xf32> to vector<2x1xf32>
      %195 = vector.shape_cast %194 : vector<2x1xf32> to vector<2x1x1xf32>
      %196 = vector.shape_cast %193 : vector<3x64xf32> to vector<1x3x64xf32>
      %197 = vector.broadcast %195 : vector<2x1x1xf32> to vector<2x3x64xf32>
      %198 = vector.broadcast %196 : vector<1x3x64xf32> to vector<2x3x64xf32>
      %199 = arith.mulf %197, %198 : vector<2x3x64xf32>
      %200 = arith.addf %192, %199 : vector<2x3x64xf32>
      %201 = vector.extract_strided_slice %23 {offsets = [0, 1408], sizes = [3, 64], strides = [1, 1]} : vector<3x2048xf32> to vector<3x64xf32>
      %202 = vector.extract_strided_slice %22 {offsets = [0, 22], sizes = [2, 1], strides = [1, 1]} : vector<2x32xf32> to vector<2x1xf32>
      %203 = vector.shape_cast %202 : vector<2x1xf32> to vector<2x1x1xf32>
      %204 = vector.shape_cast %201 : vector<3x64xf32> to vector<1x3x64xf32>
      %205 = vector.broadcast %203 : vector<2x1x1xf32> to vector<2x3x64xf32>
      %206 = vector.broadcast %204 : vector<1x3x64xf32> to vector<2x3x64xf32>
      %207 = arith.mulf %205, %206 : vector<2x3x64xf32>
      %208 = arith.addf %200, %207 : vector<2x3x64xf32>
      %209 = vector.extract_strided_slice %23 {offsets = [0, 1472], sizes = [3, 64], strides = [1, 1]} : vector<3x2048xf32> to vector<3x64xf32>
      %210 = vector.extract_strided_slice %22 {offsets = [0, 23], sizes = [2, 1], strides = [1, 1]} : vector<2x32xf32> to vector<2x1xf32>
      %211 = vector.shape_cast %210 : vector<2x1xf32> to vector<2x1x1xf32>
      %212 = vector.shape_cast %209 : vector<3x64xf32> to vector<1x3x64xf32>
      %213 = vector.broadcast %211 : vector<2x1x1xf32> to vector<2x3x64xf32>
      %214 = vector.broadcast %212 : vector<1x3x64xf32> to vector<2x3x64xf32>
      %215 = arith.mulf %213, %214 : vector<2x3x64xf32>
      %216 = arith.addf %208, %215 : vector<2x3x64xf32>
      %217 = vector.extract_strided_slice %23 {offsets = [0, 1536], sizes = [3, 64], strides = [1, 1]} : vector<3x2048xf32> to vector<3x64xf32>
      %218 = vector.extract_strided_slice %22 {offsets = [0, 24], sizes = [2, 1], strides = [1, 1]} : vector<2x32xf32> to vector<2x1xf32>
      %219 = vector.shape_cast %218 : vector<2x1xf32> to vector<2x1x1xf32>
      %220 = vector.shape_cast %217 : vector<3x64xf32> to vector<1x3x64xf32>
      %221 = vector.broadcast %219 : vector<2x1x1xf32> to vector<2x3x64xf32>
      %222 = vector.broadcast %220 : vector<1x3x64xf32> to vector<2x3x64xf32>
      %223 = arith.mulf %221, %222 : vector<2x3x64xf32>
      %224 = arith.addf %216, %223 : vector<2x3x64xf32>
      %225 = vector.extract_strided_slice %23 {offsets = [0, 1600], sizes = [3, 64], strides = [1, 1]} : vector<3x2048xf32> to vector<3x64xf32>
      %226 = vector.extract_strided_slice %22 {offsets = [0, 25], sizes = [2, 1], strides = [1, 1]} : vector<2x32xf32> to vector<2x1xf32>
      %227 = vector.shape_cast %226 : vector<2x1xf32> to vector<2x1x1xf32>
      %228 = vector.shape_cast %225 : vector<3x64xf32> to vector<1x3x64xf32>
      %229 = vector.broadcast %227 : vector<2x1x1xf32> to vector<2x3x64xf32>
      %230 = vector.broadcast %228 : vector<1x3x64xf32> to vector<2x3x64xf32>
      %231 = arith.mulf %229, %230 : vector<2x3x64xf32>
      %232 = arith.addf %224, %231 : vector<2x3x64xf32>
      %233 = vector.extract_strided_slice %23 {offsets = [0, 1664], sizes = [3, 64], strides = [1, 1]} : vector<3x2048xf32> to vector<3x64xf32>
      %234 = vector.extract_strided_slice %22 {offsets = [0, 26], sizes = [2, 1], strides = [1, 1]} : vector<2x32xf32> to vector<2x1xf32>
      %235 = vector.shape_cast %234 : vector<2x1xf32> to vector<2x1x1xf32>
      %236 = vector.shape_cast %233 : vector<3x64xf32> to vector<1x3x64xf32>
      %237 = vector.broadcast %235 : vector<2x1x1xf32> to vector<2x3x64xf32>
      %238 = vector.broadcast %236 : vector<1x3x64xf32> to vector<2x3x64xf32>
      %239 = arith.mulf %237, %238 : vector<2x3x64xf32>
      %240 = arith.addf %232, %239 : vector<2x3x64xf32>
      %241 = vector.extract_strided_slice %23 {offsets = [0, 1728], sizes = [3, 64], strides = [1, 1]} : vector<3x2048xf32> to vector<3x64xf32>
      %242 = vector.extract_strided_slice %22 {offsets = [0, 27], sizes = [2, 1], strides = [1, 1]} : vector<2x32xf32> to vector<2x1xf32>
      %243 = vector.shape_cast %242 : vector<2x1xf32> to vector<2x1x1xf32>
      %244 = vector.shape_cast %241 : vector<3x64xf32> to vector<1x3x64xf32>
      %245 = vector.broadcast %243 : vector<2x1x1xf32> to vector<2x3x64xf32>
      %246 = vector.broadcast %244 : vector<1x3x64xf32> to vector<2x3x64xf32>
      %247 = arith.mulf %245, %246 : vector<2x3x64xf32>
      %248 = arith.addf %240, %247 : vector<2x3x64xf32>
      %249 = vector.extract_strided_slice %23 {offsets = [0, 1792], sizes = [3, 64], strides = [1, 1]} : vector<3x2048xf32> to vector<3x64xf32>
      %250 = vector.extract_strided_slice %22 {offsets = [0, 28], sizes = [2, 1], strides = [1, 1]} : vector<2x32xf32> to vector<2x1xf32>
      %251 = vector.shape_cast %250 : vector<2x1xf32> to vector<2x1x1xf32>
      %252 = vector.shape_cast %249 : vector<3x64xf32> to vector<1x3x64xf32>
      %253 = vector.broadcast %251 : vector<2x1x1xf32> to vector<2x3x64xf32>
      %254 = vector.broadcast %252 : vector<1x3x64xf32> to vector<2x3x64xf32>
      %255 = arith.mulf %253, %254 : vector<2x3x64xf32>
      %256 = arith.addf %248, %255 : vector<2x3x64xf32>
      %257 = vector.extract_strided_slice %23 {offsets = [0, 1856], sizes = [3, 64], strides = [1, 1]} : vector<3x2048xf32> to vector<3x64xf32>
      %258 = vector.extract_strided_slice %22 {offsets = [0, 29], sizes = [2, 1], strides = [1, 1]} : vector<2x32xf32> to vector<2x1xf32>
      %259 = vector.shape_cast %258 : vector<2x1xf32> to vector<2x1x1xf32>
      %260 = vector.shape_cast %257 : vector<3x64xf32> to vector<1x3x64xf32>
      %261 = vector.broadcast %259 : vector<2x1x1xf32> to vector<2x3x64xf32>
      %262 = vector.broadcast %260 : vector<1x3x64xf32> to vector<2x3x64xf32>
      %263 = arith.mulf %261, %262 : vector<2x3x64xf32>
      %264 = arith.addf %256, %263 : vector<2x3x64xf32>
      %265 = vector.extract_strided_slice %23 {offsets = [0, 1920], sizes = [3, 64], strides = [1, 1]} : vector<3x2048xf32> to vector<3x64xf32>
      %266 = vector.extract_strided_slice %22 {offsets = [0, 30], sizes = [2, 1], strides = [1, 1]} : vector<2x32xf32> to vector<2x1xf32>
      %267 = vector.shape_cast %266 : vector<2x1xf32> to vector<2x1x1xf32>
      %268 = vector.shape_cast %265 : vector<3x64xf32> to vector<1x3x64xf32>
      %269 = vector.broadcast %267 : vector<2x1x1xf32> to vector<2x3x64xf32>
      %270 = vector.broadcast %268 : vector<1x3x64xf32> to vector<2x3x64xf32>
      %271 = arith.mulf %269, %270 : vector<2x3x64xf32>
      %272 = arith.addf %264, %271 : vector<2x3x64xf32>
      %273 = vector.extract_strided_slice %23 {offsets = [0, 1984], sizes = [3, 64], strides = [1, 1]} : vector<3x2048xf32> to vector<3x64xf32>
      %274 = vector.extract_strided_slice %22 {offsets = [0, 31], sizes = [2, 1], strides = [1, 1]} : vector<2x32xf32> to vector<2x1xf32>
      %275 = vector.shape_cast %274 : vector<2x1xf32> to vector<2x1x1xf32>
      %276 = vector.shape_cast %273 : vector<3x64xf32> to vector<1x3x64xf32>
      %277 = vector.broadcast %275 : vector<2x1x1xf32> to vector<2x3x64xf32>
      %278 = vector.broadcast %276 : vector<1x3x64xf32> to vector<2x3x64xf32>
      %279 = arith.mulf %277, %278 : vector<2x3x64xf32>
      %280 = arith.addf %272, %279 : vector<2x3x64xf32>
      %c0_19 = arith.constant 0 : index
      %c0_20 = arith.constant 0 : index
      %281 = vector.load %arg7[%c0_19, %c0_20] : memref<3x64xf32, #tpu.memory_space<vmem>>, vector<3x64xf32>
      %282 = vector.shape_cast %281 : vector<3x64xf32> to vector<1x3x64xf32>
      %283 = vector.broadcast %282 : vector<1x3x64xf32> to vector<2x3x64xf32>
      %284 = arith.addf %280, %283 : vector<2x3x64xf32>
      %285 = math.tanh %284 : vector<2x3x64xf32>
      %c0_21 = arith.constant 0 : index
      %c0_22 = arith.constant 0 : index
      %c0_23 = arith.constant 0 : index
      %286 = vector.load %arg8[%c0_21, %c0_22, %c0_23] : memref<2x3x64xf32, #tpu.memory_space<vmem>>, vector<2x3x64xf32>
      tpu.vector_store %arg8[%c0_21, %c0_22, %c0_23], %285 {strides = array<i32>} : memref<2x3x64xf32, #tpu.memory_space<vmem>>, vector<2x3x64xf32>,
    } else {
    }
    return
  }
  func.func @transform_0(%arg0: i32) -> (i32, i32) {
    %c0_i32 = arith.constant 0 : i32
    %c0_i32_0 = arith.constant 0 : i32
    %c0_i32_1 = arith.constant 0 : i32
    return %c0_i32, %c0_i32_0 : i32, i32
  }
  func.func @transform_1(%arg0: i32) -> (i32, i32) {
    %c0_i32 = arith.constant 0 : i32
    %c0_i32_0 = arith.constant 0 : i32
    %c0_i32_1 = arith.constant 0 : i32
    return %c0_i32, %c0_i32_0 : i32, i32
  }
  func.func @transform_2(%arg0: i32) -> (i32, i32) {
    %c0_i32 = arith.constant 0 : i32
    %c0_i32_0 = arith.constant 0 : i32
    %c0_i32_1 = arith.constant 0 : i32
    return %c0_i32, %c0_i32_0 : i32, i32
  }
  func.func @transform_3(%arg0: i32) -> (i32, i32) {
    %c0_i32 = arith.constant 0 : i32
    %c0_i32_0 = arith.constant 0 : i32
    %c0_i32_1 = arith.constant 0 : i32
    return %c0_i32, %c0_i32_0 : i32, i32
  }
  func.func @transform_4(%arg0: i32) -> (i32, i32) {
    %c0_i32 = arith.constant 0 : i32
    %c0_i32_0 = arith.constant 0 : i32
    return %arg0, %c0_i32 : i32, i32
  }
  func.func @transform_5(%arg0: i32) -> (i32, i32) {
    %c0_i32 = arith.constant 0 : i32
    %c0_i32_0 = arith.constant 0 : i32
    return %c0_i32, %arg0 : i32, i32
  }
  func.func @transform_6(%arg0: i32) -> (i32, i32) {
    %c0_i32 = arith.constant 0 : i32
    %c0_i32_0 = arith.constant 0 : i32
    %c0_i32_1 = arith.constant 0 : i32
    return %c0_i32, %c0_i32_0 : i32, i32
  }
  func.func @transform_7(%arg0: i32) -> (i32, i32, i32) {
    %c0_i32 = arith.constant 0 : i32
    %c0_i32_0 = arith.constant 0 : i32
    %c0_i32_1 = arith.constant 0 : i32
    %c0_i32_2 = arith.constant 0 : i32
    return %c0_i32, %c0_i32_0, %c0_i32_1 : i32, i32, i32
  }
}

</mosaic_0001>

<bundles_post_ra>
// kernel: _lambda_.1
= control target key start
LH: loop header
LB: loop body
LE: loop exit
PB: predicated region body
PF: predicated region fallthrough
CT: control target
= control target key end

     0   :  { %12 = vsyncpa [#allocation4], 0  ;;  %s4476_s0 = inlined_call_operand.hbm [shape: f32[1,32], index: 0, kind: input, shape index: {}]   ;;  %s4477_s1 = inlined_call_operand.hbm [shape: f32[1,32], index: 1, kind: input, shape index: {}]   ;;  %s4478_s2 = inlined_call_operand.vmem [shape: f32[2,32], index: 2, kind: input, shape index: {}]   ;;  %s4479_s3 = inlined_call_operand.vmem [shape: f32[2,32], index: 3, kind: input, shape index: {}]   ;;  %s4480_s4 = inlined_call_operand.hbm [shape: bf16[512,2048], index: 4, kind: input, shape index: {}]   ;;  %s4481_s5 = inlined_call_operand.hbm [shape: bf16[3,512], index: 5, kind: input, shape index: {}]   ;;  %s4482_s6 = inlined_call_operand.hbm [shape: f32[3,64], index: 6, kind: input, shape index: {}]   ;;  %s4483_s7 = inlined_call_operand.vmem [shape: f32[2,3,64], index: 7, kind: output, shape index: {}]  }
   0x1   :  { %13 = vsyncpa [#allocation6], 0  ;;  %s3718_s24 = smov 0   ;;  %s3720_s25 = smov 0  }
   0x2   :  { %s3722_s26 = smov 0   ;;  %s3724_s27 = smov 0  }
   0x3 LB: > { %s3737_s28 = sadd.s32 4294967295, %s3635_s27   ;;  %s3740_s29 = sadd.s32 1, %s3635_s27   ;;  %s3635_s27 = sphi %s3724_s27, %s4506_s27   ;;  %s3631_s26 = sphi %s3722_s26, %s4505_s26   ;;  %s3627_s25 = sphi %s3720_s25, %s4504_s25   ;;  %s3623_s24 = sphi %s3718_s24, %s4503_s24  }
   0x4   : > { %s107_s30 = ssub.s32 %s3635_s27, %s3740_s29  ;;  %s110_s8 = sadd.s32 1, %s3631_s26 }
   0x5   : > { %p108_p0 = scmp.eq.s32.totalorder %s107_s30, 0  ;;  %p117_p1 = scmp.ne.s32.totalorder %s3631_s26, %s3627_s25 }
   0x6   : > { %p118_p2 = scmp.eq.s32.totalorder %s3635_s27, 0  ;;  %p123_p3 = scmp.ne.s32.totalorder %s3627_s25, %s3623_s24 }
   0x7   : > { %s3750_s9 = scalar_select %p108_p0, %s3631_s26, %s110_s8  }
   0x8   : > { %p3752_p4 = por %p118_p2, %p117_p1  ;;  %p4484_p5 = scmp.eq.s32.totalorder %s3737_s28, 0 }
   0x9   : > { %p3000_p6 = scmp.ge.s32.totalorder %s3635_s27, 1  ;;  %p202_p7 = scmp.lt.s32.totalorder %s3635_s27, 3 }
   0xa   : > { %p3761_p8 = por %p4484_p5, %p123_p3  ;;  %s3637_s13 = smov [#allocation3]  }
   0xb   : > { %p3766_p10 = pnand %p3000_p6, %p202_p7  ;;  %s215_s14 = sshll.u32 %s3637_s13, 4  ;;  %s216_s14 = int_to_ptr.vmem [resolvable:$true] %s215_s14 }
   0xc   : > { %s4489_s11 = scalar_select %p3761_p8, 1, 0 }
   0xd   : > { %s4490_s12 = scalar_select %p3766_p10, 1, 0 }
   0xe   : > { %p3301_p11 = pneg %p3766_p10  ;;  %p3321_p12 = scmp.lt.s32.totalorder %s3635_s27, 2 }
   0xf   : > { %s3638_s16 = smov [#allocation5]   ;;  %s254_s19 = sand.u32 1, %s3635_s27  }
  0x10   : > { %p3775_p13 = pnand %p3301_p11, %p4484_p5  ;;  %s226_s17 = sshll.u32 %s3638_s16, 4  ;;  %s227_s17 = int_to_ptr.vmem [resolvable:$true] %s226_s17 }
  0x11   : > { %p3781_p0 = pnand %p3321_p12, %p3752_p4  ;;  %s3466_s20 = scalar_lea.vmem %s216_s14, 16 }
  0x12   : > { %p4487_p1 = pneg %p3775_p13  ;;  %p3467_p2 = scmp.ne.s32.totalorder %s216_s14, %s3466_s20 }
  0x13   : > { %s3473_s21 = scalar_lea.vmem %s216_s14, 32  ;;  %p3474_p7 = scmp.lt.s32.totalorder %s216_s14, %s216_s14 }
  0x14   : > { %p3469_p3 = pnand %p3467_p2, %p4487_p1  ;;  %p3475_p11 = scmp.lt.s32.totalorder %s3473_s21, %s3466_s20 }
  0x16   : > { %p3470_p6 = pneg %p3469_p3  ;;  %p3476_p9 = por %p3475_p11, %p3474_p7 }
  0x18   : > { %p3477_p5 = pnand %p3476_p9, %p3470_p6 }
  0x1a   : > { %3480 = shalt.err (!%p3477_p5)
}
  0x1b   : > { %3304 = dma.hbm_to_vmem [thread:$0]  (!%p3775_p13), %s4476_s0, 16, %s216_s14, [#allocation4]  }
  0x1c   : > { %s3492_s24 = scalar_lea.vmem %s227_s17, 16  ;;  %s3499_s30 = scalar_lea.vmem %s227_s17, 32 }
  0x1d   : > { %p3493_p4 = scmp.ne.s32.totalorder %s227_s17, %s3492_s24  ;;  %p3500_p3 = scmp.lt.s32.totalorder %s227_s17, %s227_s17 }
  0x1e   : > { %p3501_p8 = scmp.lt.s32.totalorder %s3499_s30, %s3492_s24 }
  0x1f   : > { %p3495_p12 = pnand %p3493_p4, %p4487_p1 }
  0x20   : > { %p3502_p10 = por %p3501_p8, %p3500_p3 }
  0x21   : > { %p3496_p2 = pneg %p3495_p12 }
  0x23   : > { %p3503_p7 = pnand %p3502_p10, %p3496_p2 }
  0x25   : > { %3506 = shalt.err (!%p3503_p7)
}
  0x26   : > { %3307 = dma.hbm_to_vmem [thread:$0]  (!%p3775_p13), %s4477_s1, 16, %s227_s17, [#allocation6]  }
  0x27   : > { %s256_s13 = sand.u32 1, %s3631_s26   ;;  %s3283_s14 = sshll.u32 %s3635_s27, 15 }
  0x28   : > { %s3005_s16 = sshll.u32 %s256_s13, 11  ;;  %s3811_s22 = scalar_lea.hbm %s4480_s4, %s3283_s14 }
  0x29   : > { %s258_s23 = scalar_lea.vmem [#allocation7], %s3005_s16  ;;  %s3817_s30 = scalar_lea.sflag [#allocation4], %s254_s19 }
  0x2a   : > { %s266_s24 = sshll.u32 %s258_s23, 4  ;;  %s3507_s17 = scalar_lea.hbm %s3811_s22, 32768  ;;  %s3813_s24 = int_to_ptr.vmem [resolvable:$true] %s266_s24 }
  0x2b   : > { %p3508_p5 = scmp.ne.s32.totalorder %s3811_s22, %s3507_s17  ;;  %p3509_p8 = pneg %p3781_p0 }
  0x2c   : > { %s3512_s14 = scalar_lea.hbm %s4480_s4, 65536  ;;  %p3513_p6 = scmp.lt.s32.totalorder %s3811_s22, %s4480_s4 }
  0x2d   : > { %p3510_p9 = pnand %p3509_p8, %p3508_p5  ;;  %p3514_p11 = scmp.lt.s32.totalorder %s3512_s14, %s3507_s17 }
  0x2f   : > { %p3511_p10 = pneg %p3510_p9  ;;  %p3515_p4 = por %p3514_p11, %p3513_p6 }
  0x31   : > { %p3516_p12 = pnand %p3515_p4, %p3511_p10 }
  0x33   : > { %3519 = shalt.err (!%p3516_p12)
}
  0x34   : > { %s3520_s19 = scalar_lea.vmem %s3813_s24, 32768  ;;  %s3639_s21 = smov [#allocation7]  }
  0x35   : > { %p3521_p2 = scmp.ne.s32.totalorder %s3813_s24, %s3520_s19  ;;  %s3525_s23 = sshll.u32 %s3639_s21, 4  ;;  %s3526_s23 = int_to_ptr.vmem [resolvable:$false] %s3525_s23 }
  0x36   : > { %s3527_s8 = scalar_lea.vmem %s3526_s23, 65536  ;;  %p3528_p5 = scmp.lt.s32.totalorder %s3813_s24, %s3526_s23 }
  0x37   : > { %p3523_p3 = pnand %p3521_p2, %p3509_p8  ;;  %p3529_p9 = scmp.lt.s32.totalorder %s3527_s8, %s3520_s19 }
  0x39   : > { %p3524_p7 = pneg %p3523_p3  ;;  %p3530_p1 = por %p3529_p9, %p3528_p5 }
  0x3b   : > { %p3531_p6 = pnand %p3530_p1, %p3524_p7 }
  0x3d   : > { %3534 = shalt.err (!%p3531_p6)
}
  0x3e   : > { %s3640_s17 = smov 1024   ;;  %s3641_s10 = smov 64  }
  0x3f   : > { %3314 = dma.hbm_to_vmem [thread:$0]  (!%p3781_p0), %s3811_s22, 32768, %s3813_s24, %s3817_s30, %s3640_s17, %s3640_s17, %s3641_s10  }
  0x40   : > { %s3642_s14 = smov [#allocation9]   ;;  %s3009_s16 = sshll.u32 %s256_s13, 2 }
  0x41   : > { %s243_s20 = sshll.u32 %s3642_s14, 4  ;;  %p4493_p1 = pneg %p3775_p13  ;;  %s244_s20 = int_to_ptr.vmem [resolvable:$true] %s243_s20 }
  0x42   : > { %s3546_s21 = scalar_lea.vmem %s244_s20, 64  ;;  %p3554_p12 = scmp.lt.s32.totalorder %s244_s20, %s244_s20 }
  0x43   : > { %p3547_p10 = scmp.ne.s32.totalorder %s244_s20, %s3546_s21  ;;  %p3555_p2 = scmp.lt.s32.totalorder %s3546_s21, %s3546_s21 }
  0x45   : > { %p3549_p11 = pnand %p3547_p10, %p4493_p1  ;;  %p3556_p3 = por %p3555_p2, %p3554_p12 }
  0x47   : > { %p3550_p4 = pneg %p3549_p11 }
  0x49   : > { %p3557_p7 = pnand %p3556_p3, %p3550_p4 }
  0x4b   : > { %3560 = shalt.err (!%p3557_p7)
}
  0x4c   : > { %3310 = dma.hbm_to_vmem [thread:$0]  (!%p3775_p13), %s4482_s6, 64, %s244_s20, [#allocation6]  }
  0x4d   : > { %s3284_s13 = sshll.u32 %s3635_s27, 6  ;;  %s280_s24 = scalar_lea.vmem [#allocation8], %s3009_s16 }
  0x4e   : > { %s288_s23 = sshll.u32 %s280_s24, 4  ;;  %s286_s10 = scalar_lea.hbm %s4481_s5, %s3284_s13  ;;  %s289_s23 = int_to_ptr.vmem [resolvable:$true] %s288_s23 }
  0x4f   : > { %s3561_s14 = scalar_lea.hbm %s286_s10, 64  ;;  %s3566_s19 = scalar_lea.hbm %s4481_s5, 128 }
  0x50   : > { %p3562_p5 = scmp.ne.s32.totalorder %s286_s10, %s3561_s14  ;;  %p3567_p13 = scmp.lt.s32.totalorder %s286_s10, %s4481_s5 }
  0x51   : > { %p3568_p10 = scmp.lt.s32.totalorder %s3566_s19, %s3561_s14 }
  0x52   : > { %p3564_p9 = pnand %p3562_p5, %p3509_p8 }
  0x53   : > { %p3569_p1 = por %p3568_p10, %p3567_p13 }
  0x54   : > { %p3565_p6 = pneg %p3564_p9 }
  0x56   : > { %p3570_p11 = pnand %p3569_p1, %p3565_p6 }
  0x58   : > { %3573 = shalt.err (!%p3570_p11)
}
  0x59   : > { %s3574_s27 = scalar_lea.vmem %s289_s23, 64  ;;  %s3643_s16 = smov [#allocation8]  }
  0x5a   : > { %p3575_p4 = scmp.ne.s32.totalorder %s289_s23, %s3574_s27  ;;  %s3579_s13 = sshll.u32 %s3643_s16, 4  ;;  %s3580_s13 = int_to_ptr.vmem [resolvable:$false] %s3579_s13 }
  0x5b   : > { %s3581_s24 = scalar_lea.vmem %s3580_s13, 128  ;;  %p3582_p3 = scmp.lt.s32.totalorder %s289_s23, %s3580_s13 }
  0x5c   : > { %p3577_p12 = pnand %p3575_p4, %p3509_p8  ;;  %p3583_p7 = scmp.lt.s32.totalorder %s3581_s24, %s3574_s27 }
  0x5e   : > { %p3578_p2 = pneg %p3577_p12  ;;  %p3584_p5 = por %p3583_p7, %p3582_p3 }
  0x60   : > { %p3585_p9 = pnand %p3584_p5, %p3578_p2 }
  0x62   : > { %3588 = shalt.err (!%p3585_p9)
}
  0x63   : > { %3317 = dma.hbm_to_vmem [thread:$0]  (!%p3781_p0), %s286_s10, 64, %s289_s23, %s3817_s30  }
  0x64   : > { %p4494_p6 = scmp.ne.s32.totalorder %s4490_s12, 0 }
  0x65   : > { %p4495_p13 = scmp.eq.s32.totalorder (!%p4494_p6), %s3737_s28, 0 }
  0x66   : > { %297 = sbr.rel (%p4494_p6) target bundleno = 1084 (0x43c), region = 48 }
  0x6b   : > { %3606 = dma.done.wait (%p4495_p13), [#allocation4], 16   ;;  %p4496_p8 = pmov %p4495_p13 }
  0x6d   : > { %3608 = vsyncadd (%p4496_p8), [#allocation4], 4294967280  ;;  %p4497_p10 = pmov %p4496_p8 }
  0x6e   : > { %p4498_p1 = pmov %p4496_p8 }
  0x6f   : > { %3610 = dma.done.wait (%p4497_p10), [#allocation6], 16  }
  0x70   : > { %3612 = vsyncadd (%p4498_p1), [#allocation6], 4294967280  ;;  %s307_s18 = sand.u32 1, %s3737_s28   ;;  %s309_s30 = sand.u32 1, %s3627_s25  }
  0x71   : > { %s3015_s23 = sshll.u32 %s309_s30, 11  ;;  %s308_s12 = scalar_lea.sflag [#allocation4], %s307_s18 }
  0x72   : > { %s3885_s8 = scalar_lea.vmem [#allocation7], %s3015_s23  ;;  %p4499_p0 = scmp.ne.s32.totalorder %s4489_s11, 0 }
  0x74   : > { %3614 = dma.done.wait (%p4499_p0), %s308_s12, 32832  }
  0x75   : > { %3616 = vsyncadd (%p4499_p0), %s308_s12, 4294934464  ;;  %s3891_s17 = sshll.u32 %s309_s30, 2  ;;  %p4500_p11 = pmov %p4498_p1 }
  0x76   : > { %s320_s10 = scalar_lea.vmem [#allocation8], %s3891_s17 }
  0x77   : > { %3618 = dma.done.wait (%p4500_p11), [#allocation6], 64   ;;  %p4501_p4 = pmov %p4498_p1 }
  0x78   : > { %v470_v0 = vld [vmem:[%s3885_s8 + $0x380] sm:$0xff]  ;;  %v471_v2 = vld [vmem:[%s3885_s8 + $0x388] sm:$0xff]  ;;  %p4502_p12 = scmp.ne.s32.totalorder %s3737_s28, 0 }
  0x79   : > { %3620 = vsyncadd (%p4501_p4), [#allocation6], 4294967232  ;;  %v478_v1 = vld [vmem:[%s3885_s8 + $0x3c0] sm:$0xff]  ;;  %v479_v4 = vld [vmem:[%s3885_s8 + $0x3c8] sm:$0xff] }
  0x7a   : > { %v3132_v3 = vcombine.high %v470_v0, %v478_v1  ;;  %v3131_v5 = vcombine.low %v470_v0, %v478_v1  ;;  %v454_v6 = vld [vmem:[%s3885_s8 + $0x300] sm:$0xff]  ;;  %v3134_v8 = vcombine.high %v471_v2, %v479_v4  ;;  %v3133_v9 = vcombine.low %v471_v2, %v479_v4  ;;  %v455_v11 = vld [vmem:[%s3885_s8 + $0x308] sm:$0xff] }
  0x7b   : > { %v462_v7 = vld [vmem:[%s3885_s8 + $0x340] sm:$0xff]  ;;  %v463_v12 = vld [vmem:[%s3885_s8 + $0x348] sm:$0xff] }
  0x7c   : > { %v3116_v10 = vcombine.high %v454_v6, %v462_v7  ;;  %v438_v13 = vld [vmem:[%s3885_s8 + $0x280] sm:$0xff]  ;;  %1905 = vmatprep.subr.bf16.mxu0 %v3132_v3  ;;  %v3118_v14 = vcombine.high %v455_v11, %v463_v12  ;;  %v439_v16 = vld [vmem:[%s3885_s8 + $0x288] sm:$0xff]  ;;  %1946 = vmatprep.subr.bf16.mxu1 %v3134_v8  ;;  %v3115_v18 = vcombine.low %v454_v6, %v462_v7 }
  0x7d   : > { %v446_v15 = vld [vmem:[%s3885_s8 + $0x2c0] sm:$0xff]  ;;  %v447_v17 = vld [vmem:[%s3885_s8 + $0x2c8] sm:$0xff]  ;;  %1906 = vmatpush1.bf16.msra.mxu0 %v3131_v5  ;;  %1947 = vmatpush1.bf16.msra.mxu1 %v3133_v9  ;;  %v3117_v19 = vcombine.low %v455_v11, %v463_v12 }
  0x7e   : > { %1907 = vmatprep.subr.bf16.mxu0 %v3116_v10  ;;  %v3100_v20 = vcombine.high %v438_v13, %v446_v15  ;;  %1948 = vmatprep.subr.bf16.mxu1 %v3118_v14  ;;  %v3102_v21 = vcombine.high %v439_v16, %v447_v17  ;;  %v422_v22 = vld [vmem:[%s3885_s8 + $0x200] sm:$0xff]  ;;  %v423_v24 = vld [vmem:[%s3885_s8 + $0x208] sm:$0xff]  ;;  %v3099_v26 = vcombine.low %v438_v13, %v446_v15 }
  0x7f   : > { %v430_v23 = vld [vmem:[%s3885_s8 + $0x240] sm:$0xff]  ;;  %v431_v25 = vld [vmem:[%s3885_s8 + $0x248] sm:$0xff]  ;;  %v3101_v27 = vcombine.low %v439_v16, %v447_v17 }
  0x80   : > { %v3084_v28 = vcombine.high %v422_v22, %v430_v23  ;;  %v3086_v29 = vcombine.high %v423_v24, %v431_v25  ;;  %v406_v30 = vld [vmem:[%s3885_s8 + $0x180] sm:$0xff]  ;;  %v407_v32 = vld [vmem:[%s3885_s8 + $0x188] sm:$0xff]  ;;  %v3083_v34 = vcombine.low %v422_v22, %v430_v23  ;;  %v3085_v35 = vcombine.low %v423_v24, %v431_v25 }
  0x81   : > { %1908 = vmatpush1.bf16.msra.mxu0 %v3115_v18  ;;  %1949 = vmatpush1.bf16.msra.mxu1 %v3117_v19  ;;  %v414_v31 = vld [vmem:[%s3885_s8 + $0x1c0] sm:$0xff]  ;;  %v415_v33 = vld [vmem:[%s3885_s8 + $0x1c8] sm:$0xff] }
  0x82   : > { %1909 = vmatprep.subr.bf16.mxu0 %v3100_v20  ;;  %1950 = vmatprep.subr.bf16.mxu1 %v3102_v21  ;;  %v3068_v36 = vcombine.high %v406_v30, %v414_v31  ;;  %v3070_v37 = vcombine.high %v407_v32, %v415_v33  ;;  %v390_v38 = vld [vmem:[%s3885_s8 + $0x100] sm:$0xff]  ;;  %v391_v40 = vld [vmem:[%s3885_s8 + $0x108] sm:$0xff]  ;;  %v3067_v42 = vcombine.low %v406_v30, %v414_v31 }
  0x83   : > { %v398_v39 = vld [vmem:[%s3885_s8 + $0x140] sm:$0xff]  ;;  %v399_v41 = vld [vmem:[%s3885_s8 + $0x148] sm:$0xff]  ;;  %v3069_v43 = vcombine.low %v407_v32, %v415_v33 }
  0x84   : > { %v3052_v44 = vcombine.high %v390_v38, %v398_v39  ;;  %v3054_v45 = vcombine.high %v391_v40, %v399_v41  ;;  %v374_v46 = vld [vmem:[%s3885_s8 + $0x80] sm:$0xff]  ;;  %v375_v48 = vld [vmem:[%s3885_s8 + $0x88] sm:$0xff]  ;;  %v3051_v50 = vcombine.low %v390_v38, %v398_v39  ;;  %v3053_v51 = vcombine.low %v391_v40, %v399_v41 }
  0x85   : > { %1910 = vmatpush1.bf16.msra.mxu0 %v3099_v26  ;;  %1951 = vmatpush1.bf16.msra.mxu1 %v3101_v27  ;;  %v382_v47 = vld [vmem:[%s3885_s8 + $0xc0] sm:$0xff]  ;;  %v383_v49 = vld [vmem:[%s3885_s8 + $0xc8] sm:$0xff] }
  0x86   : > { %1911 = vmatprep.subr.bf16.mxu0 %v3084_v28  ;;  %1952 = vmatprep.subr.bf16.mxu1 %v3086_v29  ;;  %v3036_v52 = vcombine.high %v374_v46, %v382_v47  ;;  %v3928_v53 = vld.sshfl [vmem:[%s320_s10] sm:$0x33 pattern:$0x76325410]  ;;  %v3038_v54 = vcombine.high %v375_v48, %v383_v49  ;;  %v359_v58 = vld [vmem:[%s3885_s8 + $0x8] sm:$0xff]  ;;  %v3035_v60 = vcombine.low %v374_v46, %v382_v47 }
  0x87   : > { %v358_v55 = vld [vmem:[%s3885_s8] sm:$0xff]  ;;  %v3934_v57 = vcombine.high %v3928_v53, %v3928_v53  ;;  %v367_v59 = vld [vmem:[%s3885_s8 + $0x48] sm:$0xff]  ;;  %v3037_v61 = vcombine.low %v375_v48, %v383_v49 }
  0x88   : > { %v366_v56 = vld [vmem:[%s3885_s8 + $0x40] sm:$0xff]  ;;  %v3022_v63 = vcombine.high %v359_v58, %v367_v59  ;;  %v599_v2 = vld [vmem:[%s3885_s8 + $0x788] sm:$0xff]  ;;  %v3021_v5 = vcombine.low %v359_v58, %v367_v59 }
  0x89   : > { %1912 = vmatpush1.bf16.msra.mxu0 %v3083_v34  ;;  %1953 = vmatpush1.bf16.msra.mxu1 %v3085_v35  ;;  %v3020_v62 = vcombine.high %v358_v55, %v366_v56  ;;  %v598_v0 = vld [vmem:[%s3885_s8 + $0x780] sm:$0xff]  ;;  %v607_v3 = vld [vmem:[%s3885_s8 + $0x7c8] sm:$0xff]  ;;  %v3019_v4 = vcombine.low %v358_v55, %v366_v56 }
  0x8a   : > { %1913 = vmatprep.subr.bf16.mxu0 %v3068_v36  ;;  %1954 = vmatprep.subr.bf16.mxu1 %v3070_v37  ;;  %v606_v1 = vld [vmem:[%s3885_s8 + $0x7c0] sm:$0xff]  ;;  %v3262_v7 = vcombine.high %v599_v2, %v607_v3  ;;  %v583_v10 = vld [vmem:[%s3885_s8 + $0x708] sm:$0xff]  ;;  %v3261_v13 = vcombine.low %v599_v2, %v607_v3  ;;  %v472_v2 = vld [vmem:[%s3885_s8 + $0x390] sm:$0xff] }
  0x8b   : > { %1937 = vmatprep.mubr.bf16.mxu0 %v3934_v57  ;;  %1978 = vmatprep.mubr.bf16.mxu1 %v3934_v57  ;;  %v3260_v6 = vcombine.high %v598_v0, %v606_v1  ;;  %v582_v8 = vld [vmem:[%s3885_s8 + $0x700] sm:$0xff]  ;;  %v591_v11 = vld [vmem:[%s3885_s8 + $0x748] sm:$0xff]  ;;  %v3259_v12 = vcombine.low %v598_v0, %v606_v1  ;;  %v480_v3 = vld [vmem:[%s3885_s8 + $0x3d0] sm:$0xff] }
  0x8c   : > { %v590_v9 = vld [vmem:[%s3885_s8 + $0x740] sm:$0xff]  ;;  %v3246_v15 = vcombine.high %v583_v10, %v591_v11  ;;  %v567_v18 = vld [vmem:[%s3885_s8 + $0x688] sm:$0xff]  ;;  %v3245_v21 = vcombine.low %v583_v10, %v591_v11  ;;  %v456_v10 = vld [vmem:[%s3885_s8 + $0x310] sm:$0xff] }
  0x8d   : > { %1914 = vmatpush1.bf16.msra.mxu0 %v3067_v42  ;;  %1955 = vmatpush1.bf16.msra.mxu1 %v3069_v43  ;;  %v3244_v14 = vcombine.high %v582_v8, %v590_v9  ;;  %v566_v16 = vld [vmem:[%s3885_s8 + $0x680] sm:$0xff]  ;;  %v575_v19 = vld [vmem:[%s3885_s8 + $0x6c8] sm:$0xff]  ;;  %v3243_v20 = vcombine.low %v582_v8, %v590_v9  ;;  %v3136_v8 = vcombine.high %v472_v2, %v480_v3  ;;  %v464_v11 = vld [vmem:[%s3885_s8 + $0x350] sm:$0xff] }
  0x8e   : > { %1915 = vmatprep.subr.bf16.mxu0 %v3052_v44  ;;  %1956 = vmatprep.subr.bf16.mxu1 %v3054_v45  ;;  %v574_v17 = vld [vmem:[%s3885_s8 + $0x6c0] sm:$0xff]  ;;  %v3230_v23 = vcombine.high %v567_v18, %v575_v19  ;;  %v551_v26 = vld [vmem:[%s3885_s8 + $0x608] sm:$0xff]  ;;  %v3229_v29 = vcombine.low %v567_v18, %v575_v19  ;;  %v440_v18 = vld [vmem:[%s3885_s8 + $0x290] sm:$0xff] }
  0x8f   : > { %v3228_v22 = vcombine.high %v566_v16, %v574_v17  ;;  %v550_v24 = vld [vmem:[%s3885_s8 + $0x600] sm:$0xff]  ;;  %v559_v27 = vld [vmem:[%s3885_s8 + $0x648] sm:$0xff]  ;;  %v3227_v28 = vcombine.low %v566_v16, %v574_v17  ;;  %v3120_v16 = vcombine.high %v456_v10, %v464_v11  ;;  %v448_v19 = vld [vmem:[%s3885_s8 + $0x2d0] sm:$0xff] }
  0x90   : > { %v558_v25 = vld [vmem:[%s3885_s8 + $0x640] sm:$0xff]  ;;  %v3214_v31 = vcombine.high %v551_v26, %v559_v27  ;;  %v535_v34 = vld [vmem:[%s3885_s8 + $0x588] sm:$0xff]  ;;  %v3213_v37 = vcombine.low %v551_v26, %v559_v27  ;;  %v424_v26 = vld [vmem:[%s3885_s8 + $0x210] sm:$0xff] }
  0x91   : > { %1916 = vmatpush1.bf16.msra.mxu0 %v3051_v50  ;;  %1957 = vmatpush1.bf16.msra.mxu1 %v3053_v51  ;;  %v3212_v30 = vcombine.high %v550_v24, %v558_v25  ;;  %v534_v32 = vld [vmem:[%s3885_s8 + $0x580] sm:$0xff]  ;;  %v543_v35 = vld [vmem:[%s3885_s8 + $0x5c8] sm:$0xff]  ;;  %v3211_v36 = vcombine.low %v550_v24, %v558_v25  ;;  %v3104_v24 = vcombine.high %v440_v18, %v448_v19  ;;  %v432_v27 = vld [vmem:[%s3885_s8 + $0x250] sm:$0xff] }
  0x92   : > { %1917 = vmatprep.subr.bf16.mxu0 %v3036_v52  ;;  %1958 = vmatprep.subr.bf16.mxu1 %v3038_v54  ;;  %v542_v33 = vld [vmem:[%s3885_s8 + $0x5c0] sm:$0xff]  ;;  %v3198_v39 = vcombine.high %v535_v34, %v543_v35  ;;  %v519_v42 = vld [vmem:[%s3885_s8 + $0x508] sm:$0xff]  ;;  %v3197_v45 = vcombine.low %v535_v34, %v543_v35  ;;  %v408_v34 = vld [vmem:[%s3885_s8 + $0x190] sm:$0xff] }
  0x93   : > { %v3196_v38 = vcombine.high %v534_v32, %v542_v33  ;;  %v518_v40 = vld [vmem:[%s3885_s8 + $0x500] sm:$0xff]  ;;  %v527_v43 = vld [vmem:[%s3885_s8 + $0x548] sm:$0xff]  ;;  %v3195_v44 = vcombine.low %v534_v32, %v542_v33  ;;  %v3088_v32 = vcombine.high %v424_v26, %v432_v27  ;;  %v416_v35 = vld [vmem:[%s3885_s8 + $0x1d0] sm:$0xff] }
  0x94   : > { %v526_v41 = vld [vmem:[%s3885_s8 + $0x540] sm:$0xff]  ;;  %v3182_v47 = vcombine.high %v519_v42, %v527_v43  ;;  %v503_v50 = vld [vmem:[%s3885_s8 + $0x488] sm:$0xff]  ;;  %v3181_v54 = vcombine.low %v519_v42, %v527_v43  ;;  %v392_v42 = vld [vmem:[%s3885_s8 + $0x110] sm:$0xff] }
  0x95   : > { %1918 = vmatpush1.bf16.msra.mxu0 %v3035_v60  ;;  %1959 = vmatpush1.bf16.msra.mxu1 %v3037_v61  ;;  %v3180_v46 = vcombine.high %v518_v40, %v526_v41  ;;  %v502_v48 = vld [vmem:[%s3885_s8 + $0x480] sm:$0xff]  ;;  %v511_v51 = vld [vmem:[%s3885_s8 + $0x4c8] sm:$0xff]  ;;  %v3179_v52 = vcombine.low %v518_v40, %v526_v41  ;;  %v3072_v40 = vcombine.high %v408_v34, %v416_v35  ;;  %v400_v43 = vld [vmem:[%s3885_s8 + $0x150] sm:$0xff] }
  0x96   : > { %1919 = vmatprep.subr.bf16.mxu0 %v3020_v62  ;;  %1960 = vmatprep.subr.bf16.mxu1 %v3022_v63  ;;  %v510_v49 = vld [vmem:[%s3885_s8 + $0x4c0] sm:$0xff]  ;;  %v3166_v56 = vcombine.high %v503_v50, %v511_v51  ;;  %v487_v60 = vld [vmem:[%s3885_s8 + $0x408] sm:$0xff]  ;;  %v3165_v63 = vcombine.low %v503_v50, %v511_v51  ;;  %v376_v50 = vld [vmem:[%s3885_s8 + $0x90] sm:$0xff] }
  0x97   : > { %v3164_v55 = vcombine.high %v502_v48, %v510_v49  ;;  %v486_v58 = vld [vmem:[%s3885_s8 + $0x400] sm:$0xff]  ;;  %v495_v61 = vld [vmem:[%s3885_s8 + $0x448] sm:$0xff]  ;;  %v3163_v62 = vcombine.low %v502_v48, %v510_v49  ;;  %v3056_v48 = vcombine.high %v392_v42, %v400_v43  ;;  %v384_v51 = vld [vmem:[%s3885_s8 + $0xd0] sm:$0xff] }
  0x98   : > { %v494_v59 = vld [vmem:[%s3885_s8 + $0x440] sm:$0xff]  ;;  %v3150_v1 = vcombine.high %v487_v60, %v495_v61 }
  0x99   : > { %1920 = vmatpush1.bf16.msra.mxu0 %v3019_v4  ;;  %1961 = vmatpush1.bf16.msra.mxu1 %v3021_v5  ;;  %v3148_v0 = vcombine.high %v486_v58, %v494_v59  ;;  %v473_v4 = vld [vmem:[%s3885_s8 + $0x398] sm:$0xff] }
  0x9a   : > { %1921 = vmatprep.subr.bf16.mxu0 %v3260_v6  ;;  %1962 = vmatprep.subr.bf16.mxu1 %v3262_v7  ;;  %v481_v5 = vld [vmem:[%s3885_s8 + $0x3d8] sm:$0xff]  ;;  %v3147_v6 = vcombine.low %v486_v58, %v494_v59  ;;  %v3149_v7 = vcombine.low %v487_v60, %v495_v61  ;;  %v3040_v58 = vcombine.high %v376_v50, %v384_v51  ;;  %v360_v60 = vld [vmem:[%s3885_s8 + $0x10] sm:$0xff] }
  0x9b   : > { %v3138_v9 = vcombine.high %v473_v4, %v481_v5  ;;  %v368_v61 = vld [vmem:[%s3885_s8 + $0x50] sm:$0xff] }
  0x9d   : > { %1922 = vmatpush2.bf16.msra.mxu0 %v3259_v12  ;;  %1963 = vmatpush2.bf16.msra.mxu1 %v3261_v13  ;;  %v457_v12 = vld [vmem:[%s3885_s8 + $0x318] sm:$0xff] }
  0x9e   : > { %1923 = vmatprep.subr.bf16.mxu0 %v3244_v14  ;;  %1964 = vmatprep.subr.bf16.mxu1 %v3246_v15  ;;  %v465_v13 = vld [vmem:[%s3885_s8 + $0x358] sm:$0xff]  ;;  %v3135_v14 = vcombine.low %v472_v2, %v480_v3  ;;  %v3137_v15 = vcombine.low %v473_v4, %v481_v5  ;;  %v3024_v2 = vcombine.high %v360_v60, %v368_v61  ;;  %v600_v4 = vld [vmem:[%s3885_s8 + $0x790] sm:$0xff] }
  0x9f   : > { %v3122_v17 = vcombine.high %v457_v12, %v465_v13  ;;  %v608_v5 = vld [vmem:[%s3885_s8 + $0x7d0] sm:$0xff] }
  0xa1   : > { %1924 = vmatpush2.bf16.msra.mxu0 %v3243_v20  ;;  %1965 = vmatpush2.bf16.msra.mxu1 %v3245_v21  ;;  %v441_v20 = vld [vmem:[%s3885_s8 + $0x298] sm:$0xff] }
  0xa2   : > { %1925 = vmatprep.subr.bf16.mxu0 %v3228_v22  ;;  %1966 = vmatprep.subr.bf16.mxu1 %v3230_v23  ;;  %v449_v21 = vld [vmem:[%s3885_s8 + $0x2d8] sm:$0xff]  ;;  %v3119_v22 = vcombine.low %v456_v10, %v464_v11  ;;  %v3121_v23 = vcombine.low %v457_v12, %v465_v13  ;;  %v3264_v10 = vcombine.high %v600_v4, %v608_v5  ;;  %v584_v12 = vld [vmem:[%s3885_s8 + $0x710] sm:$0xff] }
  0xa3   : > { %v3106_v25 = vcombine.high %v441_v20, %v449_v21  ;;  %v592_v13 = vld [vmem:[%s3885_s8 + $0x750] sm:$0xff] }
  0xa5   : > { %1926 = vmatpush2.bf16.msra.mxu0 %v3227_v28  ;;  %1967 = vmatpush2.bf16.msra.mxu1 %v3229_v29  ;;  %v425_v28 = vld [vmem:[%s3885_s8 + $0x218] sm:$0xff] }
  0xa6   : > { %1927 = vmatprep.subr.bf16.mxu0 %v3212_v30  ;;  %1968 = vmatprep.subr.bf16.mxu1 %v3214_v31  ;;  %v433_v29 = vld [vmem:[%s3885_s8 + $0x258] sm:$0xff]  ;;  %v3103_v30 = vcombine.low %v440_v18, %v448_v19  ;;  %v3105_v31 = vcombine.low %v441_v20, %v449_v21  ;;  %v3248_v18 = vcombine.high %v584_v12, %v592_v13  ;;  %v568_v20 = vld [vmem:[%s3885_s8 + $0x690] sm:$0xff] }
  0xa7   : > { %v3090_v33 = vcombine.high %v425_v28, %v433_v29  ;;  %v576_v21 = vld [vmem:[%s3885_s8 + $0x6d0] sm:$0xff] }
  0xa9   : > { %1928 = vmatpush2.bf16.msra.mxu0 %v3211_v36  ;;  %1969 = vmatpush2.bf16.msra.mxu1 %v3213_v37  ;;  %v409_v36 = vld [vmem:[%s3885_s8 + $0x198] sm:$0xff] }
  0xaa   : > { %1929 = vmatprep.subr.bf16.mxu0 %v3196_v38  ;;  %1970 = vmatprep.subr.bf16.mxu1 %v3198_v39  ;;  %v417_v37 = vld [vmem:[%s3885_s8 + $0x1d8] sm:$0xff]  ;;  %v3087_v38 = vcombine.low %v424_v26, %v432_v27  ;;  %v3089_v39 = vcombine.low %v425_v28, %v433_v29  ;;  %v3232_v26 = vcombine.high %v568_v20, %v576_v21  ;;  %v552_v28 = vld [vmem:[%s3885_s8 + $0x610] sm:$0xff] }
  0xab   : > { %v3074_v41 = vcombine.high %v409_v36, %v417_v37  ;;  %v560_v29 = vld [vmem:[%s3885_s8 + $0x650] sm:$0xff] }
  0xad   : > { %1930 = vmatpush2.bf16.msra.mxu0 %v3195_v44  ;;  %1971 = vmatpush2.bf16.msra.mxu1 %v3197_v45  ;;  %v393_v44 = vld [vmem:[%s3885_s8 + $0x118] sm:$0xff] }
  0xae   : > { %1931 = vmatprep.subr.bf16.mxu0 %v3180_v46  ;;  %1972 = vmatprep.subr.bf16.mxu1 %v3182_v47  ;;  %v401_v45 = vld [vmem:[%s3885_s8 + $0x158] sm:$0xff]  ;;  %v3071_v46 = vcombine.low %v408_v34, %v416_v35  ;;  %v3073_v47 = vcombine.low %v409_v36, %v417_v37  ;;  %v3216_v34 = vcombine.high %v552_v28, %v560_v29  ;;  %v536_v36 = vld [vmem:[%s3885_s8 + $0x590] sm:$0xff] }
  0xaf   : > { %v3058_v49 = vcombine.high %v393_v44, %v401_v45  ;;  %v544_v37 = vld [vmem:[%s3885_s8 + $0x5d0] sm:$0xff] }
  0xb1   : > { %1932 = vmatpush2.bf16.msra.mxu0 %v3179_v52  ;;  %1973 = vmatpush2.bf16.msra.mxu1 %v3181_v54  ;;  %v377_v52 = vld [vmem:[%s3885_s8 + $0x98] sm:$0xff] }
  0xb2   : > { %1933 = vmatprep.subr.bf16.mxu0 %v3164_v55  ;;  %1974 = vmatprep.subr.bf16.mxu1 %v3166_v56  ;;  %v385_v54 = vld [vmem:[%s3885_s8 + $0xd8] sm:$0xff]  ;;  %v3055_v55 = vcombine.low %v392_v42, %v400_v43  ;;  %v3057_v56 = vcombine.low %v393_v44, %v401_v45  ;;  %v3200_v42 = vcombine.high %v536_v36, %v544_v37  ;;  %v520_v44 = vld [vmem:[%s3885_s8 + $0x510] sm:$0xff] }
  0xb3   : > { %v3042_v59 = vcombine.high %v377_v52, %v385_v54  ;;  %v528_v45 = vld [vmem:[%s3885_s8 + $0x550] sm:$0xff] }
  0xb5   : > { %1934 = vmatpush2.bf16.msra.mxu0 %v3163_v62  ;;  %1975 = vmatpush2.bf16.msra.mxu1 %v3165_v63  ;;  %v361_v62 = vld [vmem:[%s3885_s8 + $0x18] sm:$0xff] }
  0xb6   : > { %1935 = vmatprep.subr.bf16.mxu0 %v3148_v0  ;;  %1976 = vmatprep.subr.bf16.mxu1 %v3150_v1  ;;  %v369_v63 = vld [vmem:[%s3885_s8 + $0x58] sm:$0xff]  ;;  %v3039_v0 = vcombine.low %v376_v50, %v384_v51  ;;  %v3041_v1 = vcombine.low %v377_v52, %v385_v54  ;;  %v3184_v50 = vcombine.high %v520_v44, %v528_v45  ;;  %v504_v52 = vld [vmem:[%s3885_s8 + $0x490] sm:$0xff] }
  0xb7   : > { %v3026_v3 = vcombine.high %v361_v62, %v369_v63  ;;  %v512_v54 = vld [vmem:[%s3885_s8 + $0x4d0] sm:$0xff] }
  0xb9   : > { %1936 = vmatpush2.bf16.msra.mxu0 %v3147_v6  ;;  %1977 = vmatpush2.bf16.msra.mxu1 %v3149_v7  ;;  %v601_v6 = vld [vmem:[%s3885_s8 + $0x798] sm:$0xff] }
  0xba   : > { %1987 = vmatprep.subr.bf16.mxu0 %v3136_v8  ;;  %2028 = vmatprep.subr.bf16.mxu1 %v3138_v9  ;;  %v609_v7 = vld [vmem:[%s3885_s8 + $0x7d8] sm:$0xff]  ;;  %v3023_v8 = vcombine.low %v360_v60, %v368_v61  ;;  %v3025_v9 = vcombine.low %v361_v62, %v369_v63  ;;  %v3168_v60 = vcombine.high %v504_v52, %v512_v54  ;;  %v488_v62 = vld [vmem:[%s3885_s8 + $0x410] sm:$0xff] }
  0xbb   : > { %v3266_v11 = vcombine.high %v601_v6, %v609_v7  ;;  %v496_v63 = vld [vmem:[%s3885_s8 + $0x450] sm:$0xff] }
  0xbc   : > { %1938 = vmatmul.mubr.bf16.vlgmr.msra.gmra.mxu0 %v3928_v53  ;;  %1979 = vmatmul.mubr.bf16.vlgmr.msra.gmra.mxu1 %v3928_v53 }
  0xbd   : > { %1988 = vmatpush1.bf16.msra.mxu0 %v3135_v14  ;;  %2029 = vmatpush1.bf16.msra.mxu1 %v3137_v15  ;;  %v585_v14 = vld [vmem:[%s3885_s8 + $0x718] sm:$0xff] }
  0xbe   : > { %1989 = vmatprep.subr.bf16.mxu0 %v3120_v16  ;;  %2030 = vmatprep.subr.bf16.mxu1 %v3122_v17  ;;  %v593_v15 = vld [vmem:[%s3885_s8 + $0x758] sm:$0xff]  ;;  %v3263_v16 = vcombine.low %v600_v4, %v608_v5  ;;  %v3265_v17 = vcombine.low %v601_v6, %v609_v7  ;;  %v3152_v4 = vcombine.high %v488_v62, %v496_v63  ;;  %v474_v6 = vld [vmem:[%s3885_s8 + $0x3a0] sm:$0xff] }
  0xbf   : > { %2019 = vmatprep.mubr.bf16.mxu0 %v3934_v57  ;;  %2060 = vmatprep.mubr.bf16.mxu1 %v3934_v57  ;;  %v3250_v19 = vcombine.high %v585_v14, %v593_v15  ;;  %v482_v7 = vld [vmem:[%s3885_s8 + $0x3e0] sm:$0xff] }
  0xc1   : > { %1990 = vmatpush1.bf16.msra.mxu0 %v3119_v22  ;;  %2031 = vmatpush1.bf16.msra.mxu1 %v3121_v23  ;;  %v569_v22 = vld [vmem:[%s3885_s8 + $0x698] sm:$0xff] }
  0xc2   : > { %1991 = vmatprep.subr.bf16.mxu0 %v3104_v24  ;;  %2032 = vmatprep.subr.bf16.mxu1 %v3106_v25  ;;  %v577_v23 = vld [vmem:[%s3885_s8 + $0x6d8] sm:$0xff]  ;;  %v3247_v24 = vcombine.low %v584_v12, %v592_v13  ;;  %v3249_v25 = vcombine.low %v585_v14, %v593_v15  ;;  %v3140_v12 = vcombine.high %v474_v6, %v482_v7  ;;  %v458_v14 = vld [vmem:[%s3885_s8 + $0x320] sm:$0xff] }
  0xc3   : > { %v3234_v27 = vcombine.high %v569_v22, %v577_v23  ;;  %v466_v15 = vld [vmem:[%s3885_s8 + $0x360] sm:$0xff] }
  0xc5   : > { %1992 = vmatpush1.bf16.msra.mxu0 %v3103_v30  ;;  %2033 = vmatpush1.bf16.msra.mxu1 %v3105_v31  ;;  %v553_v30 = vld [vmem:[%s3885_s8 + $0x618] sm:$0xff] }
  0xc6   : > { %1993 = vmatprep.subr.bf16.mxu0 %v3088_v32  ;;  %2034 = vmatprep.subr.bf16.mxu1 %v3090_v33  ;;  %v561_v31 = vld [vmem:[%s3885_s8 + $0x658] sm:$0xff]  ;;  %v3231_v32 = vcombine.low %v568_v20, %v576_v21  ;;  %v3233_v33 = vcombine.low %v569_v22, %v577_v23  ;;  %v3124_v20 = vcombine.high %v458_v14, %v466_v15  ;;  %v442_v22 = vld [vmem:[%s3885_s8 + $0x2a0] sm:$0xff] }
  0xc7   : > { %v3218_v35 = vcombine.high %v553_v30, %v561_v31  ;;  %v450_v23 = vld [vmem:[%s3885_s8 + $0x2e0] sm:$0xff] }
  0xc9   : > { %1994 = vmatpush1.bf16.msra.mxu0 %v3087_v38  ;;  %2035 = vmatpush1.bf16.msra.mxu1 %v3089_v39  ;;  %v537_v38 = vld [vmem:[%s3885_s8 + $0x598] sm:$0xff] }
  0xca   : > { %1995 = vmatprep.subr.bf16.mxu0 %v3072_v40  ;;  %2036 = vmatprep.subr.bf16.mxu1 %v3074_v41  ;;  %v545_v39 = vld [vmem:[%s3885_s8 + $0x5d8] sm:$0xff]  ;;  %v3215_v40 = vcombine.low %v552_v28, %v560_v29  ;;  %v3217_v41 = vcombine.low %v553_v30, %v561_v31  ;;  %v3108_v28 = vcombine.high %v442_v22, %v450_v23  ;;  %v426_v30 = vld [vmem:[%s3885_s8 + $0x220] sm:$0xff] }
  0xcb   : > { %v3202_v43 = vcombine.high %v537_v38, %v545_v39  ;;  %v434_v31 = vld [vmem:[%s3885_s8 + $0x260] sm:$0xff] }
  0xcd   : > { %1996 = vmatpush1.bf16.msra.mxu0 %v3071_v46  ;;  %2037 = vmatpush1.bf16.msra.mxu1 %v3073_v47  ;;  %v521_v46 = vld [vmem:[%s3885_s8 + $0x518] sm:$0xff] }
  0xce   : > { %1997 = vmatprep.subr.bf16.mxu0 %v3056_v48  ;;  %2038 = vmatprep.subr.bf16.mxu1 %v3058_v49  ;;  %v529_v47 = vld [vmem:[%s3885_s8 + $0x558] sm:$0xff]  ;;  %v3199_v48 = vcombine.low %v536_v36, %v544_v37  ;;  %v3201_v49 = vcombine.low %v537_v38, %v545_v39  ;;  %v410_v37 = vld [vmem:[%s3885_s8 + $0x1a0] sm:$0xff]  ;;  %v411_v39 = vld [vmem:[%s3885_s8 + $0x1a8] sm:$0xff] }
  0xcf   : > { %v3186_v51 = vcombine.high %v521_v46, %v529_v47  ;;  %v418_v38 = vld [vmem:[%s3885_s8 + $0x1e0] sm:$0xff] }
  0xd1   : > { %1998 = vmatpush1.bf16.msra.mxu0 %v3055_v55  ;;  %2039 = vmatpush1.bf16.msra.mxu1 %v3057_v56  ;;  %v505_v55 = vld [vmem:[%s3885_s8 + $0x498] sm:$0xff] }
  0xd2   : > { %1999 = vmatprep.subr.bf16.mxu0 %v3040_v58  ;;  %2040 = vmatprep.subr.bf16.mxu1 %v3042_v59  ;;  %v513_v56 = vld [vmem:[%s3885_s8 + $0x4d8] sm:$0xff]  ;;  %v3183_v58 = vcombine.low %v520_v44, %v528_v45  ;;  %v3185_v59 = vcombine.low %v521_v46, %v529_v47  ;;  %v394_v45 = vld [vmem:[%s3885_s8 + $0x120] sm:$0xff]  ;;  %v395_v47 = vld [vmem:[%s3885_s8 + $0x128] sm:$0xff] }
  0xd3   : > { %v3170_v61 = vcombine.high %v505_v55, %v513_v56  ;;  %v402_v46 = vld [vmem:[%s3885_s8 + $0x160] sm:$0xff] }
  0xd5   : > { %2000 = vmatpush1.bf16.msra.mxu0 %v3039_v0  ;;  %2041 = vmatpush1.bf16.msra.mxu1 %v3041_v1  ;;  %v489_v0 = vld [vmem:[%s3885_s8 + $0x418] sm:$0xff] }
  0xd6   : > { %2001 = vmatprep.subr.bf16.mxu0 %v3024_v2  ;;  %2042 = vmatprep.subr.bf16.mxu1 %v3026_v3  ;;  %v497_v1 = vld [vmem:[%s3885_s8 + $0x458] sm:$0xff]  ;;  %v3167_v2 = vcombine.low %v504_v52, %v512_v54  ;;  %v3169_v3 = vcombine.low %v505_v55, %v513_v56  ;;  %v378_v54 = vld [vmem:[%s3885_s8 + $0xa0] sm:$0xff]  ;;  %v379_v56 = vld [vmem:[%s3885_s8 + $0xa8] sm:$0xff] }
  0xd7   : > { %v3154_v5 = vcombine.high %v489_v0, %v497_v1  ;;  %v386_v55 = vld [vmem:[%s3885_s8 + $0xe0] sm:$0xff] }
  0xd9   : > { %2002 = vmatpush1.bf16.msra.mxu0 %v3023_v8  ;;  %2043 = vmatpush1.bf16.msra.mxu1 %v3025_v9  ;;  %v475_v8 = vld [vmem:[%s3885_s8 + $0x3a8] sm:$0xff] }
  0xda   : > { %2003 = vmatprep.subr.bf16.mxu0 %v3264_v10  ;;  %2044 = vmatprep.subr.bf16.mxu1 %v3266_v11  ;;  %v483_v9 = vld [vmem:[%s3885_s8 + $0x3e8] sm:$0xff]  ;;  %v3151_v10 = vcombine.low %v488_v62, %v496_v63  ;;  %v3153_v11 = vcombine.low %v489_v0, %v497_v1  ;;  %v362_v63 = vld [vmem:[%s3885_s8 + $0x20] sm:$0xff] }
  0xdb   : > { %v3142_v13 = vcombine.high %v475_v8, %v483_v9  ;;  %v370_v0 = vld [vmem:[%s3885_s8 + $0x60] sm:$0xff]  ;;  %v363_v1 = vld [vmem:[%s3885_s8 + $0x28] sm:$0xff] }
  0xdd   : > { %2004 = vmatpush2.bf16.msra.mxu0 %v3263_v16  ;;  %2045 = vmatpush2.bf16.msra.mxu1 %v3265_v17  ;;  %v459_v16 = vld [vmem:[%s3885_s8 + $0x328] sm:$0xff] }
  0xde   : > { %2005 = vmatprep.subr.bf16.mxu0 %v3248_v18  ;;  %2046 = vmatprep.subr.bf16.mxu1 %v3250_v19  ;;  %v467_v17 = vld [vmem:[%s3885_s8 + $0x368] sm:$0xff]  ;;  %v3139_v18 = vcombine.low %v474_v6, %v482_v7  ;;  %v3141_v19 = vcombine.low %v475_v8, %v483_v9  ;;  %v602_v7 = vld [vmem:[%s3885_s8 + $0x7a0] sm:$0xff] }
  0xdf   : > { %v3126_v21 = vcombine.high %v459_v16, %v467_v17  ;;  %v610_v8 = vld [vmem:[%s3885_s8 + $0x7e0] sm:$0xff]  ;;  %v603_v9 = vld [vmem:[%s3885_s8 + $0x7a8] sm:$0xff] }
  0xe1   : > { %2006 = vmatpush2.bf16.msra.mxu0 %v3247_v24  ;;  %2047 = vmatpush2.bf16.msra.mxu1 %v3249_v25  ;;  %v443_v24 = vld [vmem:[%s3885_s8 + $0x2a8] sm:$0xff] }
  0xe2   : > { %2007 = vmatprep.subr.bf16.mxu0 %v3232_v26  ;;  %2048 = vmatprep.subr.bf16.mxu1 %v3234_v27  ;;  %v451_v25 = vld [vmem:[%s3885_s8 + $0x2e8] sm:$0xff]  ;;  %v3123_v26 = vcombine.low %v458_v14, %v466_v15  ;;  %v3125_v27 = vcombine.low %v459_v16, %v467_v17  ;;  %v586_v15 = vld [vmem:[%s3885_s8 + $0x720] sm:$0xff] }
  0xe3   : > { %v3110_v29 = vcombine.high %v443_v24, %v451_v25  ;;  %v594_v16 = vld [vmem:[%s3885_s8 + $0x760] sm:$0xff]  ;;  %v587_v17 = vld [vmem:[%s3885_s8 + $0x728] sm:$0xff] }
  0xe5   : > { %2008 = vmatpush2.bf16.msra.mxu0 %v3231_v32  ;;  %2049 = vmatpush2.bf16.msra.mxu1 %v3233_v33  ;;  %v427_v32 = vld [vmem:[%s3885_s8 + $0x228] sm:$0xff] }
  0xe6   : > { %2009 = vmatprep.subr.bf16.mxu0 %v3216_v34  ;;  %2050 = vmatprep.subr.bf16.mxu1 %v3218_v35  ;;  %v435_v33 = vld [vmem:[%s3885_s8 + $0x268] sm:$0xff]  ;;  %v3109_v34 = vcombine.low %v443_v24, %v451_v25  ;;  %v3092_v35 = vcombine.high %v426_v30, %v434_v31  ;;  %v578_v24 = vld [vmem:[%s3885_s8 + $0x6e0] sm:$0xff] }
  0xe7   : > { %v3094_v36 = vcombine.high %v427_v32, %v435_v33  ;;  %v571_v25 = vld [vmem:[%s3885_s8 + $0x6a8] sm:$0xff] }
  0xe9   : > { %2010 = vmatpush2.bf16.msra.mxu0 %v3215_v40  ;;  %2051 = vmatpush2.bf16.msra.mxu1 %v3217_v41  ;;  %v419_v40 = vld [vmem:[%s3885_s8 + $0x1e8] sm:$0xff]  ;;  %v3091_v41 = vcombine.low %v426_v30, %v434_v31  ;;  %v554_v31 = vld [vmem:[%s3885_s8 + $0x620] sm:$0xff] }
  0xea   : > { %2011 = vmatprep.subr.bf16.mxu0 %v3200_v42  ;;  %2052 = vmatprep.subr.bf16.mxu1 %v3202_v43  ;;  %v3093_v42 = vcombine.low %v427_v32, %v435_v33  ;;  %v3076_v43 = vcombine.high %v410_v37, %v418_v38  ;;  %v3078_v44 = vcombine.high %v411_v39, %v419_v40  ;;  %v562_v32 = vld [vmem:[%s3885_s8 + $0x660] sm:$0xff]  ;;  %v555_v33 = vld [vmem:[%s3885_s8 + $0x628] sm:$0xff] }
  0xed   : > { %2012 = vmatpush2.bf16.msra.mxu0 %v3199_v48  ;;  %2053 = vmatpush2.bf16.msra.mxu1 %v3201_v49  ;;  %v403_v48 = vld [vmem:[%s3885_s8 + $0x168] sm:$0xff]  ;;  %v3075_v49 = vcombine.low %v410_v37, %v418_v38  ;;  %v538_v38 = vld [vmem:[%s3885_s8 + $0x5a0] sm:$0xff] }
  0xee   : > { %2013 = vmatprep.subr.bf16.mxu0 %v3184_v50  ;;  %2054 = vmatprep.subr.bf16.mxu1 %v3186_v51  ;;  %v3077_v50 = vcombine.low %v411_v39, %v419_v40  ;;  %v3060_v51 = vcombine.high %v394_v45, %v402_v46  ;;  %v3062_v52 = vcombine.high %v395_v47, %v403_v48  ;;  %v546_v39 = vld [vmem:[%s3885_s8 + $0x5e0] sm:$0xff]  ;;  %v539_v40 = vld [vmem:[%s3885_s8 + $0x5a8] sm:$0xff] }
  0xf1   : > { %2014 = vmatpush2.bf16.msra.mxu0 %v3183_v58  ;;  %2055 = vmatpush2.bf16.msra.mxu1 %v3185_v59  ;;  %v387_v58 = vld [vmem:[%s3885_s8 + $0xe8] sm:$0xff]  ;;  %v3059_v59 = vcombine.low %v394_v45, %v402_v46  ;;  %v522_v46 = vld [vmem:[%s3885_s8 + $0x520] sm:$0xff] }
  0xf2   : > { %2015 = vmatprep.subr.bf16.mxu0 %v3168_v60  ;;  %2056 = vmatprep.subr.bf16.mxu1 %v3170_v61  ;;  %v3061_v60 = vcombine.low %v395_v47, %v403_v48  ;;  %v3044_v61 = vcombine.high %v378_v54, %v386_v55  ;;  %v3046_v62 = vcombine.high %v379_v56, %v387_v58  ;;  %v530_v47 = vld [vmem:[%s3885_s8 + $0x560] sm:$0xff]  ;;  %v523_v48 = vld [vmem:[%s3885_s8 + $0x528] sm:$0xff] }
  0xf5   : > { %2016 = vmatpush2.bf16.msra.mxu0 %v3167_v2  ;;  %2057 = vmatpush2.bf16.msra.mxu1 %v3169_v3  ;;  %v371_v2 = vld [vmem:[%s3885_s8 + $0x68] sm:$0xff]  ;;  %v3043_v3 = vcombine.low %v378_v54, %v386_v55  ;;  %v506_v55 = vld [vmem:[%s3885_s8 + $0x4a0] sm:$0xff] }
  0xf6   : > { %2017 = vmatprep.subr.bf16.mxu0 %v3152_v4  ;;  %2058 = vmatprep.subr.bf16.mxu1 %v3154_v5  ;;  %v3045_v4 = vcombine.low %v379_v56, %v387_v58  ;;  %v3028_v5 = vcombine.high %v362_v63, %v370_v0  ;;  %v3030_v6 = vcombine.high %v363_v1, %v371_v2  ;;  %v514_v56 = vld [vmem:[%s3885_s8 + $0x4e0] sm:$0xff]  ;;  %v507_v58 = vld [vmem:[%s3885_s8 + $0x4a8] sm:$0xff] }
  0xf9   : > { %2018 = vmatpush2.bf16.msra.mxu0 %v3151_v10  ;;  %2059 = vmatpush2.bf16.msra.mxu1 %v3153_v11  ;;  %v611_v10 = vld [vmem:[%s3885_s8 + $0x7e8] sm:$0xff]  ;;  %v3027_v11 = vcombine.low %v362_v63, %v370_v0  ;;  %v490_v0 = vld [vmem:[%s3885_s8 + $0x420] sm:$0xff] }
  0xfa   : > { %2069 = vmatprep.subr.bf16.mxu0 %v3140_v12  ;;  %2110 = vmatprep.subr.bf16.mxu1 %v3142_v13  ;;  %v3029_v12 = vcombine.low %v363_v1, %v371_v2  ;;  %v3268_v13 = vcombine.high %v602_v7, %v610_v8  ;;  %v3270_v14 = vcombine.high %v603_v9, %v611_v10  ;;  %v498_v1 = vld [vmem:[%s3885_s8 + $0x460] sm:$0xff]  ;;  %v491_v2 = vld [vmem:[%s3885_s8 + $0x428] sm:$0xff] }
  0xfc   : > { %2020 = vmatmul.mubr.bf16.vlgmr.msra.gmra.mxu0 %v3928_v53  ;;  %2061 = vmatmul.mubr.bf16.vlgmr.msra.gmra.mxu1 %v3928_v53  ;;  %v3107_v53 = vcombine.low %v442_v22, %v450_v23  ;;  %v570_v23 = vld [vmem:[%s3885_s8 + $0x6a0] sm:$0xff] }
  0xfd   : > { %2070 = vmatpush1.bf16.msra.mxu0 %v3139_v18  ;;  %2111 = vmatpush1.bf16.msra.mxu1 %v3141_v19  ;;  %v595_v18 = vld [vmem:[%s3885_s8 + $0x768] sm:$0xff]  ;;  %v3267_v19 = vcombine.low %v602_v7, %v610_v8  ;;  %v476_v8 = vld [vmem:[%s3885_s8 + $0x3b0] sm:$0xff] }
  0xfe   : > { %2071 = vmatprep.subr.bf16.mxu0 %v3124_v20  ;;  %2112 = vmatprep.subr.bf16.mxu1 %v3126_v21  ;;  %v3269_v20 = vcombine.low %v603_v9, %v611_v10  ;;  %v3252_v21 = vcombine.high %v586_v15, %v594_v16  ;;  %v3254_v22 = vcombine.high %v587_v17, %v595_v18  ;;  %v484_v9 = vld [vmem:[%s3885_s8 + $0x3f0] sm:$0xff]  ;;  %v477_v10 = vld [vmem:[%s3885_s8 + $0x3b8] sm:$0xff] }
  0xff   : > { %2101 = vmatprep.mubr.bf16.mxu0 %v3934_v57  ;;  %2142 = vmatprep.mubr.bf16.mxu1 %v3934_v57 }
 0x101   : > { %2072 = vmatpush1.bf16.msra.mxu0 %v3123_v26  ;;  %2113 = vmatpush1.bf16.msra.mxu1 %v3125_v27  ;;  %v579_v26 = vld [vmem:[%s3885_s8 + $0x6e8] sm:$0xff]  ;;  %v3251_v27 = vcombine.low %v586_v15, %v594_v16  ;;  %v460_v16 = vld [vmem:[%s3885_s8 + $0x330] sm:$0xff] }
 0x102   : > { %2073 = vmatprep.subr.bf16.mxu0 %v3108_v28  ;;  %2114 = vmatprep.subr.bf16.mxu1 %v3110_v29  ;;  %v3253_v28 = vcombine.low %v587_v17, %v595_v18  ;;  %v3236_v29 = vcombine.high %v570_v23, %v578_v24  ;;  %v3238_v30 = vcombine.high %v571_v25, %v579_v26  ;;  %v468_v17 = vld [vmem:[%s3885_s8 + $0x370] sm:$0xff]  ;;  %v461_v18 = vld [vmem:[%s3885_s8 + $0x338] sm:$0xff] }
 0x105   : > { %2074 = vmatpush1.bf16.msra.mxu0 %v3107_v53  ;;  %2115 = vmatpush1.bf16.msra.mxu1 %v3109_v34  ;;  %v563_v53 = vld [vmem:[%s3885_s8 + $0x668] sm:$0xff]  ;;  %v3235_v34 = vcombine.low %v570_v23, %v578_v24  ;;  %v444_v24 = vld [vmem:[%s3885_s8 + $0x2b0] sm:$0xff] }
 0x106   : > { %2075 = vmatprep.subr.bf16.mxu0 %v3092_v35  ;;  %2116 = vmatprep.subr.bf16.mxu1 %v3094_v36  ;;  %v3237_v35 = vcombine.low %v571_v25, %v579_v26  ;;  %v3220_v36 = vcombine.high %v554_v31, %v562_v32  ;;  %v3222_v37 = vcombine.high %v555_v33, %v563_v53  ;;  %v452_v25 = vld [vmem:[%s3885_s8 + $0x2f0] sm:$0xff]  ;;  %v4120_v26 = vld.sshfl [vmem:[%s320_s10] sm:$0x33 pattern:$0x76325410] }
 0x109   : > { %2076 = vmatpush1.bf16.msra.mxu0 %v3091_v41  ;;  %2117 = vmatpush1.bf16.msra.mxu1 %v3093_v42  ;;  %v547_v41 = vld [vmem:[%s3885_s8 + $0x5e8] sm:$0xff]  ;;  %v3219_v42 = vcombine.low %v554_v31, %v562_v32  ;;  %v3112_v31 = vcombine.high %v444_v24, %v452_v25 }
 0x10a   : > { %2077 = vmatprep.subr.bf16.mxu0 %v3076_v43  ;;  %2118 = vmatprep.subr.bf16.mxu1 %v3078_v44  ;;  %v3221_v43 = vcombine.low %v555_v33, %v563_v53  ;;  %v3204_v44 = vcombine.high %v538_v38, %v546_v39  ;;  %v3206_v45 = vcombine.high %v539_v40, %v547_v41  ;;  %v428_v33 = vld [vmem:[%s3885_s8 + $0x230] sm:$0xff] }
 0x10b   : > { %v436_v53 = vld [vmem:[%s3885_s8 + $0x270] sm:$0xff] }
 0x10d   : > { %2078 = vmatpush1.bf16.msra.mxu0 %v3075_v49  ;;  %2119 = vmatpush1.bf16.msra.mxu1 %v3077_v50  ;;  %v531_v49 = vld [vmem:[%s3885_s8 + $0x568] sm:$0xff]  ;;  %v3203_v50 = vcombine.low %v538_v38, %v546_v39  ;;  %v3096_v38 = vcombine.high %v428_v33, %v436_v53 }
 0x10e   : > { %2079 = vmatprep.subr.bf16.mxu0 %v3060_v51  ;;  %2120 = vmatprep.subr.bf16.mxu1 %v3062_v52  ;;  %v3205_v51 = vcombine.low %v539_v40, %v547_v41  ;;  %v3188_v52 = vcombine.high %v522_v46, %v530_v47  ;;  %v3190_v54 = vcombine.high %v523_v48, %v531_v49  ;;  %v412_v40 = vld [vmem:[%s3885_s8 + $0x1b0] sm:$0xff] }
 0x10f   : > { %v420_v41 = vld [vmem:[%s3885_s8 + $0x1f0] sm:$0xff] }
 0x111   : > { %2080 = vmatpush1.bf16.msra.mxu0 %v3059_v59  ;;  %2121 = vmatpush1.bf16.msra.mxu1 %v3061_v60  ;;  %v515_v59 = vld [vmem:[%s3885_s8 + $0x4e8] sm:$0xff]  ;;  %v3187_v60 = vcombine.low %v522_v46, %v530_v47  ;;  %v396_v47 = vld [vmem:[%s3885_s8 + $0x130] sm:$0xff] }
 0x112   : > { %2081 = vmatprep.subr.bf16.mxu0 %v3044_v61  ;;  %2122 = vmatprep.subr.bf16.mxu1 %v3046_v62  ;;  %v3189_v61 = vcombine.low %v523_v48, %v531_v49  ;;  %v3172_v62 = vcombine.high %v506_v55, %v514_v56  ;;  %v3174_v63 = vcombine.high %v507_v58, %v515_v59  ;;  %v404_v48 = vld [vmem:[%s3885_s8 + $0x170] sm:$0xff]  ;;  %v397_v49 = vld [vmem:[%s3885_s8 + $0x138] sm:$0xff] }
 0x115   : > { %2082 = vmatpush1.bf16.msra.mxu0 %v3043_v3  ;;  %2123 = vmatpush1.bf16.msra.mxu1 %v3045_v4  ;;  %v499_v3 = vld [vmem:[%s3885_s8 + $0x468] sm:$0xff]  ;;  %v3171_v4 = vcombine.low %v506_v55, %v514_v56  ;;  %v380_v56 = vld [vmem:[%s3885_s8 + $0xb0] sm:$0xff] }
 0x116   : > { %2083 = vmatprep.subr.bf16.mxu0 %v3028_v5  ;;  %2124 = vmatprep.subr.bf16.mxu1 %v3030_v6  ;;  %v3173_v5 = vcombine.low %v507_v58, %v515_v59  ;;  %v3156_v6 = vcombine.high %v490_v0, %v498_v1  ;;  %v3158_v7 = vcombine.high %v491_v2, %v499_v3  ;;  %v388_v58 = vld [vmem:[%s3885_s8 + $0xf0] sm:$0xff]  ;;  %v381_v59 = vld [vmem:[%s3885_s8 + $0xb8] sm:$0xff] }
 0x119   : > { %2084 = vmatpush1.bf16.msra.mxu0 %v3027_v11  ;;  %2125 = vmatpush1.bf16.msra.mxu1 %v3029_v12  ;;  %v485_v11 = vld [vmem:[%s3885_s8 + $0x3f8] sm:$0xff]  ;;  %v3155_v12 = vcombine.low %v490_v0, %v498_v1  ;;  %v364_v1 = vld [vmem:[%s3885_s8 + $0x30] sm:$0xff] }
 0x11a   : > { %2085 = vmatprep.subr.bf16.mxu0 %v3268_v13  ;;  %2126 = vmatprep.subr.bf16.mxu1 %v3270_v14  ;;  %v3157_v13 = vcombine.low %v491_v2, %v499_v3  ;;  %v3144_v14 = vcombine.high %v476_v8, %v484_v9  ;;  %v3146_v15 = vcombine.high %v477_v10, %v485_v11  ;;  %v372_v2 = vld [vmem:[%s3885_s8 + $0x70] sm:$0xff]  ;;  %v365_v3 = vld [vmem:[%s3885_s8 + $0x38] sm:$0xff] }
 0x11d   : > { %2086 = vmatpush2.bf16.msra.mxu0 %v3267_v19  ;;  %2127 = vmatpush2.bf16.msra.mxu1 %v3269_v20  ;;  %v469_v19 = vld [vmem:[%s3885_s8 + $0x378] sm:$0xff]  ;;  %v3143_v20 = vcombine.low %v476_v8, %v484_v9  ;;  %v604_v9 = vld [vmem:[%s3885_s8 + $0x7b0] sm:$0xff] }
 0x11e   : > { %2087 = vmatprep.subr.bf16.mxu0 %v3252_v21  ;;  %2128 = vmatprep.subr.bf16.mxu1 %v3254_v22  ;;  %v3145_v21 = vcombine.low %v477_v10, %v485_v11  ;;  %v3128_v22 = vcombine.high %v460_v16, %v468_v17  ;;  %v3130_v23 = vcombine.high %v461_v18, %v469_v19  ;;  %v612_v10 = vld [vmem:[%s3885_s8 + $0x7f0] sm:$0xff]  ;;  %v605_v11 = vld [vmem:[%s3885_s8 + $0x7b8] sm:$0xff] }
 0x121   : > { %2088 = vmatpush2.bf16.msra.mxu0 %v3251_v27  ;;  %2129 = vmatpush2.bf16.msra.mxu1 %v3253_v28  ;;  %v445_v27 = vld [vmem:[%s3885_s8 + $0x2b8] sm:$0xff] }
 0x122   : > { %2089 = vmatprep.subr.bf16.mxu0 %v3236_v29  ;;  %2130 = vmatprep.subr.bf16.mxu1 %v3238_v30  ;;  %v453_v28 = vld [vmem:[%s3885_s8 + $0x2f8] sm:$0xff]  ;;  %v3127_v29 = vcombine.low %v460_v16, %v468_v17  ;;  %v3129_v30 = vcombine.low %v461_v18, %v469_v19  ;;  %v588_v17 = vld [vmem:[%s3885_s8 + $0x730] sm:$0xff] }
 0x123   : > { %v3114_v32 = vcombine.high %v445_v27, %v453_v28  ;;  %v596_v18 = vld [vmem:[%s3885_s8 + $0x770] sm:$0xff]  ;;  %v589_v19 = vld [vmem:[%s3885_s8 + $0x738] sm:$0xff] }
 0x125   : > { %2090 = vmatpush2.bf16.msra.mxu0 %v3235_v34  ;;  %2131 = vmatpush2.bf16.msra.mxu1 %v3237_v35  ;;  %v429_v34 = vld [vmem:[%s3885_s8 + $0x238] sm:$0xff] }
 0x126   : > { %2091 = vmatprep.subr.bf16.mxu0 %v3220_v36  ;;  %2132 = vmatprep.subr.bf16.mxu1 %v3222_v37  ;;  %v437_v35 = vld [vmem:[%s3885_s8 + $0x278] sm:$0xff]  ;;  %v3111_v36 = vcombine.low %v444_v24, %v452_v25  ;;  %v3113_v37 = vcombine.low %v445_v27, %v453_v28  ;;  %v572_v25 = vld [vmem:[%s3885_s8 + $0x6b0] sm:$0xff] }
 0x127   : > { %v3098_v39 = vcombine.high %v429_v34, %v437_v35  ;;  %v580_v27 = vld [vmem:[%s3885_s8 + $0x6f0] sm:$0xff]  ;;  %v573_v28 = vld [vmem:[%s3885_s8 + $0x6b8] sm:$0xff] }
 0x129   : > { %2092 = vmatpush2.bf16.msra.mxu0 %v3219_v42  ;;  %2133 = vmatpush2.bf16.msra.mxu1 %v3221_v43  ;;  %v413_v42 = vld [vmem:[%s3885_s8 + $0x1b8] sm:$0xff] }
 0x12a   : > { %2093 = vmatprep.subr.bf16.mxu0 %v3204_v44  ;;  %2134 = vmatprep.subr.bf16.mxu1 %v3206_v45  ;;  %v421_v43 = vld [vmem:[%s3885_s8 + $0x1f8] sm:$0xff]  ;;  %v3095_v44 = vcombine.low %v428_v33, %v436_v53  ;;  %v3080_v45 = vcombine.high %v412_v40, %v420_v41  ;;  %v556_v53 = vld [vmem:[%s3885_s8 + $0x630] sm:$0xff] }
 0x12b   : > { %v3082_v46 = vcombine.high %v413_v42, %v421_v43 }
 0x12d   : > { %2094 = vmatpush2.bf16.msra.mxu0 %v3203_v50  ;;  %2135 = vmatpush2.bf16.msra.mxu1 %v3205_v51  ;;  %v405_v50 = vld [vmem:[%s3885_s8 + $0x178] sm:$0xff]  ;;  %v3079_v51 = vcombine.low %v412_v40, %v420_v41  ;;  %v540_v41 = vld [vmem:[%s3885_s8 + $0x5b0] sm:$0xff] }
 0x12e   : > { %2095 = vmatprep.subr.bf16.mxu0 %v3188_v52  ;;  %2136 = vmatprep.subr.bf16.mxu1 %v3190_v54  ;;  %v3081_v52 = vcombine.low %v413_v42, %v421_v43  ;;  %v3064_v54 = vcombine.high %v396_v47, %v404_v48  ;;  %v3066_v55 = vcombine.high %v397_v49, %v405_v50  ;;  %v548_v42 = vld [vmem:[%s3885_s8 + $0x5f0] sm:$0xff]  ;;  %v541_v43 = vld [vmem:[%s3885_s8 + $0x5b8] sm:$0xff] }
 0x131   : > { %2096 = vmatpush2.bf16.msra.mxu0 %v3187_v60  ;;  %2137 = vmatpush2.bf16.msra.mxu1 %v3189_v61  ;;  %v389_v60 = vld [vmem:[%s3885_s8 + $0xf8] sm:$0xff]  ;;  %v3063_v61 = vcombine.low %v396_v47, %v404_v48  ;;  %v524_v48 = vld [vmem:[%s3885_s8 + $0x530] sm:$0xff] }
 0x132   : > { %2097 = vmatprep.subr.bf16.mxu0 %v3172_v62  ;;  %2138 = vmatprep.subr.bf16.mxu1 %v3174_v63  ;;  %v3065_v62 = vcombine.low %v397_v49, %v405_v50  ;;  %v3048_v63 = vcombine.high %v380_v56, %v388_v58  ;;  %v3050_v0 = vcombine.high %v381_v59, %v389_v60  ;;  %v532_v49 = vld [vmem:[%s3885_s8 + $0x570] sm:$0xff]  ;;  %v525_v50 = vld [vmem:[%s3885_s8 + $0x538] sm:$0xff] }
 0x135   : > { %2098 = vmatpush2.bf16.msra.mxu0 %v3171_v4  ;;  %2139 = vmatpush2.bf16.msra.mxu1 %v3173_v5  ;;  %v373_v4 = vld [vmem:[%s3885_s8 + $0x78] sm:$0xff]  ;;  %v3047_v5 = vcombine.low %v380_v56, %v388_v58  ;;  %v508_v58 = vld [vmem:[%s3885_s8 + $0x4b0] sm:$0xff] }
 0x136   : > { %2099 = vmatprep.subr.bf16.mxu0 %v3156_v6  ;;  %2140 = vmatprep.subr.bf16.mxu1 %v3158_v7  ;;  %v3049_v6 = vcombine.low %v381_v59, %v389_v60  ;;  %v3032_v7 = vcombine.high %v364_v1, %v372_v2  ;;  %v3034_v8 = vcombine.high %v365_v3, %v373_v4  ;;  %v516_v59 = vld [vmem:[%s3885_s8 + $0x4f0] sm:$0xff]  ;;  %v509_v60 = vld [vmem:[%s3885_s8 + $0x4b8] sm:$0xff] }
 0x139   : > { %2100 = vmatpush2.bf16.msra.mxu0 %v3155_v12  ;;  %2141 = vmatpush2.bf16.msra.mxu1 %v3157_v13  ;;  %v613_v12 = vld [vmem:[%s3885_s8 + $0x7f8] sm:$0xff]  ;;  %v3031_v13 = vcombine.low %v364_v1, %v372_v2  ;;  %v492_v2 = vld [vmem:[%s3885_s8 + $0x430] sm:$0xff] }
 0x13a   : > { %2151 = vmatprep.subr.bf16.mxu0 %v3144_v14  ;;  %2192 = vmatprep.subr.bf16.mxu1 %v3146_v15  ;;  %v3033_v14 = vcombine.low %v365_v3, %v373_v4  ;;  %v3272_v15 = vcombine.high %v604_v9, %v612_v10  ;;  %v3274_v16 = vcombine.high %v605_v11, %v613_v12  ;;  %v500_v3 = vld [vmem:[%s3885_s8 + $0x470] sm:$0xff]  ;;  %v493_v4 = vld [vmem:[%s3885_s8 + $0x438] sm:$0xff] }
 0x13c   : > { %2102 = vmatmul.mubr.bf16.vlgmr.msra.gmra.mxu0 %v4120_v26  ;;  %2143 = vmatmul.mubr.bf16.vlgmr.msra.gmra.mxu1 %v4120_v26 }
 0x13d   : > { %2152 = vmatpush1.bf16.msra.mxu0 %v3143_v20  ;;  %2193 = vmatpush1.bf16.msra.mxu1 %v3145_v21  ;;  %v597_v20 = vld [vmem:[%s3885_s8 + $0x778] sm:$0xff]  ;;  %v3271_v21 = vcombine.low %v604_v9, %v612_v10  ;;  %v3159_v10 = vcombine.low %v492_v2, %v500_v3 }
 0x13e   : > { %2153 = vmatprep.subr.bf16.mxu0 %v3128_v22  ;;  %2194 = vmatprep.subr.bf16.mxu1 %v3130_v23  ;;  %v3273_v22 = vcombine.low %v605_v11, %v613_v12  ;;  %v3256_v23 = vcombine.high %v588_v17, %v596_v18  ;;  %v3258_v24 = vcombine.high %v589_v19, %v597_v20 }
 0x13f   : > { %2183 = vmatprep.mubr.bf16.mxu0 %v3934_v57  ;;  %2224 = vmatprep.mubr.bf16.mxu1 %v3934_v57  ;;  %v3097_v57 = vcombine.low %v429_v34, %v437_v35  ;;  %v564_v34 = vld [vmem:[%s3885_s8 + $0x670] sm:$0xff]  ;;  %v557_v35 = vld [vmem:[%s3885_s8 + $0x638] sm:$0xff] }
 0x141   : > { %2154 = vmatpush1.bf16.msra.mxu0 %v3127_v29  ;;  %2195 = vmatpush1.bf16.msra.mxu1 %v3129_v30  ;;  %v581_v29 = vld [vmem:[%s3885_s8 + $0x6f8] sm:$0xff]  ;;  %v3255_v30 = vcombine.low %v588_v17, %v596_v18 }
 0x142   : > { %2155 = vmatprep.subr.bf16.mxu0 %v3112_v31  ;;  %2196 = vmatprep.subr.bf16.mxu1 %v3114_v32  ;;  %v3257_v31 = vcombine.low %v589_v19, %v597_v20  ;;  %v3240_v32 = vcombine.high %v572_v25, %v580_v27  ;;  %v3242_v33 = vcombine.high %v573_v28, %v581_v29 }
 0x145   : > { %2156 = vmatpush1.bf16.msra.mxu0 %v3111_v36  ;;  %2197 = vmatpush1.bf16.msra.mxu1 %v3113_v37  ;;  %v565_v36 = vld [vmem:[%s3885_s8 + $0x678] sm:$0xff]  ;;  %v3239_v37 = vcombine.low %v572_v25, %v580_v27 }
 0x146   : > { %2157 = vmatprep.subr.bf16.mxu0 %v3096_v38  ;;  %2198 = vmatprep.subr.bf16.mxu1 %v3098_v39  ;;  %v3241_v38 = vcombine.low %v573_v28, %v581_v29  ;;  %v3224_v39 = vcombine.high %v556_v53, %v564_v34  ;;  %v3226_v40 = vcombine.high %v557_v35, %v565_v36 }
 0x149   : > { %2158 = vmatpush1.bf16.msra.mxu0 %v3095_v44  ;;  %2199 = vmatpush1.bf16.msra.mxu1 %v3097_v57  ;;  %v549_v44 = vld [vmem:[%s3885_s8 + $0x5f8] sm:$0xff]  ;;  %v3223_v57 = vcombine.low %v556_v53, %v564_v34 }
 0x14a   : > { %2159 = vmatprep.subr.bf16.mxu0 %v3080_v45  ;;  %2200 = vmatprep.subr.bf16.mxu1 %v3082_v46  ;;  %v3225_v45 = vcombine.low %v557_v35, %v565_v36  ;;  %v3208_v46 = vcombine.high %v540_v41, %v548_v42  ;;  %v3210_v47 = vcombine.high %v541_v43, %v549_v44 }
 0x14d   : > { %2160 = vmatpush1.bf16.msra.mxu0 %v3079_v51  ;;  %2201 = vmatpush1.bf16.msra.mxu1 %v3081_v52  ;;  %v533_v51 = vld [vmem:[%s3885_s8 + $0x578] sm:$0xff]  ;;  %v3207_v52 = vcombine.low %v540_v41, %v548_v42 }
 0x14e   : > { %2161 = vmatprep.subr.bf16.mxu0 %v3064_v54  ;;  %2202 = vmatprep.subr.bf16.mxu1 %v3066_v55  ;;  %v3209_v54 = vcombine.low %v541_v43, %v549_v44  ;;  %v3192_v55 = vcombine.high %v524_v48, %v532_v49  ;;  %v3194_v56 = vcombine.high %v525_v50, %v533_v51 }
 0x151   : > { %2162 = vmatpush1.bf16.msra.mxu0 %v3063_v61  ;;  %2203 = vmatpush1.bf16.msra.mxu1 %v3065_v62  ;;  %v517_v61 = vld [vmem:[%s3885_s8 + $0x4f8] sm:$0xff]  ;;  %v3191_v62 = vcombine.low %v524_v48, %v532_v49 }
 0x152   : > { %2163 = vmatprep.subr.bf16.mxu0 %v3048_v63  ;;  %2204 = vmatprep.subr.bf16.mxu1 %v3050_v0  ;;  %v3193_v63 = vcombine.low %v525_v50, %v533_v51  ;;  %v3176_v0 = vcombine.high %v508_v58, %v516_v59  ;;  %v3178_v1 = vcombine.high %v509_v60, %v517_v61 }
 0x155   : > { %2164 = vmatpush1.bf16.msra.mxu0 %v3047_v5  ;;  %2205 = vmatpush1.bf16.msra.mxu1 %v3049_v6  ;;  %v501_v5 = vld [vmem:[%s3885_s8 + $0x478] sm:$0xff]  ;;  %v3175_v6 = vcombine.low %v508_v58, %v516_v59 }
 0x156   : > { %2165 = vmatprep.subr.bf16.mxu0 %v3032_v7  ;;  %2206 = vmatprep.subr.bf16.mxu1 %v3034_v8  ;;  %v3177_v7 = vcombine.low %v509_v60, %v517_v61  ;;  %v3160_v8 = vcombine.high %v492_v2, %v500_v3  ;;  %v3162_v9 = vcombine.high %v493_v4, %v501_v5 }
 0x157   : > { %v3161_v11 = vcombine.low %v493_v4, %v501_v5 }
 0x159   : > { %2166 = vmatpush1.bf16.msra.mxu0 %v3031_v13  ;;  %2207 = vmatpush1.bf16.msra.mxu1 %v3033_v14 }
 0x15a   : > { %2167 = vmatprep.subr.bf16.mxu0 %v3272_v15  ;;  %2208 = vmatprep.subr.bf16.mxu1 %v3274_v16 }
 0x15d   : > { %2168 = vmatpush2.bf16.msra.mxu0 %v3271_v21  ;;  %2209 = vmatpush2.bf16.msra.mxu1 %v3273_v22 }
 0x15e   : > { %2169 = vmatprep.subr.bf16.mxu0 %v3256_v23  ;;  %2210 = vmatprep.subr.bf16.mxu1 %v3258_v24 }
 0x161   : > { %2170 = vmatpush2.bf16.msra.mxu0 %v3255_v30  ;;  %2211 = vmatpush2.bf16.msra.mxu1 %v3257_v31 }
 0x162   : > { %2171 = vmatprep.subr.bf16.mxu0 %v3240_v32  ;;  %2212 = vmatprep.subr.bf16.mxu1 %v3242_v33 }
 0x165   : > { %2172 = vmatpush2.bf16.msra.mxu0 %v3239_v37  ;;  %2213 = vmatpush2.bf16.msra.mxu1 %v3241_v38 }
 0x166   : > { %2173 = vmatprep.subr.bf16.mxu0 %v3224_v39  ;;  %2214 = vmatprep.subr.bf16.mxu1 %v3226_v40 }
 0x169   : > { %2174 = vmatpush2.bf16.msra.mxu0 %v3223_v57  ;;  %2215 = vmatpush2.bf16.msra.mxu1 %v3225_v45 }
 0x16a   : > { %2175 = vmatprep.subr.bf16.mxu0 %v3208_v46  ;;  %2216 = vmatprep.subr.bf16.mxu1 %v3210_v47 }
 0x16d   : > { %2176 = vmatpush2.bf16.msra.mxu0 %v3207_v52  ;;  %2217 = vmatpush2.bf16.msra.mxu1 %v3209_v54 }
 0x16e   : > { %2177 = vmatprep.subr.bf16.mxu0 %v3192_v55  ;;  %2218 = vmatprep.subr.bf16.mxu1 %v3194_v56 }
 0x171   : > { %2178 = vmatpush2.bf16.msra.mxu0 %v3191_v62  ;;  %2219 = vmatpush2.bf16.msra.mxu1 %v3193_v63 }
 0x172   : > { %2179 = vmatprep.subr.bf16.mxu0 %v3176_v0  ;;  %2220 = vmatprep.subr.bf16.mxu1 %v3178_v1 }
 0x175   : > { %2180 = vmatpush2.bf16.msra.mxu0 %v3175_v6  ;;  %2221 = vmatpush2.bf16.msra.mxu1 %v3177_v7 }
 0x176   : > { %2181 = vmatprep.subr.bf16.mxu0 %v3160_v8  ;;  %2222 = vmatprep.subr.bf16.mxu1 %v3162_v9 }
 0x179   : > { %2182 = vmatpush2.bf16.msra.mxu0 %v3159_v10  ;;  %2223 = vmatpush2.bf16.msra.mxu1 %v3161_v11 }
 0x17c   : > { %v4180_v12 = vpop.f32.mrf.mxu0  ;;  %2184 = vmatmul.mubr.bf16.vlgmr.msra.gmra.mxu0 %v4120_v26  ;;  %v4183_v13 = vpop.f32.mrf.mxu1  ;;  %2225 = vmatmul.mubr.bf16.vlgmr.msra.gmra.mxu1 %v4120_v26 }
 0x17e   : > { %v4186_v14 = vpop.f32.mrf.mxu0  ;;  %v4188_v15 = vpop.f32.mrf.mxu1 }
 0x180   : > { %v1943_v16 = vpop.f32.mrf.mxu0  ;;  %v1984_v17 = vpop.f32.mrf.mxu1 }
 0x182   : > { %v1944_v18 = vpop.f32.mrf.mxu0  ;;  %v1985_v19 = vpop.f32.mrf.mxu1 }
 0x1bc   : > { %v2021_v20 = vpop.f32.mrf.mxu0  ;;  %v2062_v21 = vpop.f32.mrf.mxu1 }
 0x1be   : > { %v2023_v22 = vpop.f32.mrf.mxu0  ;;  %v2064_v23 = vpop.f32.mrf.mxu1 }
 0x1c0   : > { %v2025_v24 = vpop.f32.mrf.mxu0  ;;  %v2066_v25 = vpop.f32.mrf.mxu1 }
 0x1c2   : > { %v2026_v27 = vpop.f32.mrf.mxu0  ;;  %v2067_v28 = vpop.f32.mrf.mxu1 }
 0x1fc   : > { %v2103_v29 = vpop.f32.mrf.mxu0  ;;  %v2144_v30 = vpop.f32.mrf.mxu1 }
 0x1fe   : > { %v2105_v31 = vpop.f32.mrf.mxu0  ;;  %v2146_v26 = vpop.f32.mrf.mxu1 }
 0x200   : > { %v2107_v32 = vpop.f32.mrf.mxu0  ;;  %v2148_v33 = vpop.f32.mrf.mxu1 }
 0x202   : > { %v2108_v53 = vpop.f32.mrf.mxu0  ;;  %v2149_v34 = vpop.f32.mrf.mxu1 }
 0x23c   : > { %v2185_v35 = vpop.f32.mrf.mxu0  ;;  %v2226_v36 = vpop.f32.mrf.mxu1 }
 0x23e   : > { %v2187_v37 = vpop.f32.mrf.mxu0  ;;  %v2228_v38 = vpop.f32.mrf.mxu1  ;;  %2236 = sbr.rel (%p4502_p12) target bundleno = 585 (0x249), region = 72 }
 0x240   : > { %v2189_v39 = vpop.f32.mrf.mxu0  ;;  %v2230_v40 = vpop.f32.mrf.mxu1 }
 0x242   : > { %v2190_v41 = vpop.f32.mrf.mxu0  ;;  %v2231_v42 = vpop.f32.mrf.mxu1 }
 0x243   : > { %v2253_v43 = vcombine.low %v4180_v12, %v4186_v14  ;;  %v2254_v44 = vcombine.low %v4183_v13, %v4188_v15  ;;  %v2255_v57 = vcombine.low %v2021_v20, %v2023_v22  ;;  %v2256_v45 = vcombine.low %v2062_v21, %v2064_v23 }
 0x244   : > { %v2257_v46 = vcombine.low %v2103_v29, %v2105_v31  ;;  %v2258_v47 = vcombine.low %v2144_v30, %v2146_v26  ;;  %v2259_v48 = vcombine.low %v2185_v35, %v2187_v37  ;;  %v2260_v49 = vcombine.low %v2226_v36, %v2228_v38 }
 0x245   : > { %2269 = vst [vmem:[#allocation2 + $0x30] sm:$0x77] %v2253_v43  ;;  %2270 = vst [vmem:[#allocation2] sm:$0x77] %v2254_v44 }
 0x246   : > { %2271 = vst [vmem:[#allocation2 + $0x18] sm:$0x77] %v2255_v57  ;;  %2272 = vst [vmem:[#allocation2 + $0x10] sm:$0x77] %v2256_v45 }
 0x247   : > { %2273 = vst [vmem:[#allocation2 + $0x8] sm:$0x77] %v2257_v46  ;;  %2274 = vst [vmem:[#allocation2 + $0x20] sm:$0x77] %v2258_v47 }
 0x248   : > { %2275 = vst [vmem:[#allocation2 + $0x28] sm:$0x77] %v2259_v48  ;;  %2276 = vst [vmem:[#allocation2 + $0x38] sm:$0x77] %v2260_v49 }
 0x249 PF: > { %p3276_p2 = scmp.le.s32.totalorder %s3737_s28, 0 }
 0x24b   : > { %2280 = sbr.rel (%p3276_p2) target bundleno = 600 (0x258), region = 76 }
 0x250   : > { %v2281_v50 = vld [vmem:[#allocation2 + $0x30] sm:$0x77]  ;;  %v2305_v51 = vcombine.low %v4180_v12, %v4186_v14  ;;  %v2282_v52 = vld [vmem:[#allocation2] sm:$0x77]  ;;  %v2306_v54 = vcombine.low %v4183_v13, %v4188_v15  ;;  %v2283_v55 = vld [vmem:[#allocation2 + $0x18] sm:$0x77]  ;;  %v2307_v56 = vcombine.low %v2021_v20, %v2023_v22  ;;  %v2308_v58 = vcombine.low %v2062_v21, %v2064_v23 }
 0x251   : > { %v2284_v59 = vld [vmem:[#allocation2 + $0x10] sm:$0x77]  ;;  %v2285_v60 = vld [vmem:[#allocation2 + $0x8] sm:$0x77]  ;;  %v2309_v61 = vcombine.low %v2103_v29, %v2105_v31  ;;  %v2286_v62 = vld [vmem:[#allocation2 + $0x20] sm:$0x77]  ;;  %v2310_v63 = vcombine.low %v2144_v30, %v2146_v26  ;;  %v2311_v0 = vcombine.low %v2185_v35, %v2187_v37  ;;  %v2312_v1 = vcombine.low %v2226_v36, %v2228_v38 }
 0x252   : > { %v2321_v2 = vadd.f32 %v2305_v51, %v2281_v50  ;;  %v2322_v3 = vadd.f32 %v2306_v54, %v2282_v52  ;;  %v2323_v4 = vadd.f32 %v2307_v56, %v2283_v55  ;;  %v2324_v5 = vadd.f32 %v2308_v58, %v2284_v59  ;;  %v2287_v6 = vld [vmem:[#allocation2 + $0x28] sm:$0x77]  ;;  %v2288_v7 = vld [vmem:[#allocation2 + $0x38] sm:$0x77] }
 0x253   : > { %v2325_v8 = vadd.f32 %v2309_v61, %v2285_v60  ;;  %v2326_v9 = vadd.f32 %v2310_v63, %v2286_v62  ;;  %v2327_v10 = vadd.f32 %v2311_v0, %v2287_v6  ;;  %v2328_v11 = vadd.f32 %v2312_v1, %v2288_v7 }
 0x254   : > { %2329 = vst [vmem:[#allocation2 + $0x30] sm:$0x77] %v2321_v2  ;;  %2330 = vst [vmem:[#allocation2] sm:$0x77] %v2322_v3 }
 0x255   : > { %2331 = vst [vmem:[#allocation2 + $0x18] sm:$0x77] %v2323_v4  ;;  %2332 = vst [vmem:[#allocation2 + $0x10] sm:$0x77] %v2324_v5 }
 0x256   : > { %2333 = vst [vmem:[#allocation2 + $0x8] sm:$0x77] %v2325_v8  ;;  %2334 = vst [vmem:[#allocation2 + $0x20] sm:$0x77] %v2326_v9 }
 0x257   : > { %2335 = vst [vmem:[#allocation2 + $0x28] sm:$0x77] %v2327_v10  ;;  %2336 = vst [vmem:[#allocation2 + $0x38] sm:$0x77] %v2328_v11 }
 0x258 PF: > { %p3277_p3 = scmp.ne.s32.totalorder %s3737_s28, 1 }
 0x259   : > { %s3649_s28 = smov (!%p3277_p3), 64  }
 0x25a   : > { %2340 = sbr.rel (%p3277_p3) target bundleno = 1084 (0x43c), region = 80 }
 0x25f   : > { %v3279_v12 = vld [vmem:[#allocation3] ss:$0 sm:$0xff]  ;;  %v2373_v14 = vlaneseq  ;;  %v3644_v15 = vmov 1   ;;  %v3278_v16 = vld [vmem:[#allocation5] ss:$0 sm:$0xff]  ;;  %v3646_v25 = vmov 0  }
 0x260   : > { %v2342_v13 = vld [vmem:[%s4478_s2] sm:$0x3]  ;;  %3398 = vset.pattern.permute.xlu1 %v3644_v15  ;;  %v3645_v20 = vmov 1966171168   ;;  %3397 = vset.pattern.permute.xlu0 %v3646_v25  ;;  %v3647_v53 = vmov 3   ;;  %v3648_v34 = vmov 2  }
 0x261   : > { %v2358_v17 = vld [vmem:[%s4479_s3] sm:$0x3]  ;;  %v2350_v18 = vmul.f32 %v3278_v16, %v2342_v13  ;;  %v2371_v21 = vunpack.c.l.s4 %v3645_v20  ;;  %v2374_v22 = vshrl.u32 %v2373_v14, 7  ;;  %v4220_v36 = vld [vmem:[#allocation2 + $0x30] sm:$0x77]  ;;  %v3650_v37 = vmov 4  }
 0x262   : > { %v2359_v19 = vmul.f32 0.1, %v2358_v17  ;;  %v3651_v38 = vmov 6   ;;  %v3652_v39 = vmov 5   ;;  %v3653_v40 = vmov 7  }
 0x263   : > { %v2357_v23 = vadd.f32 %v3279_v12, %v2350_v18  ;;  %v2372_v24 = vunpack.c.0.s8 %v2371_v21  ;;  %v2394_v30 = vsub.s32 0, %v2374_v22  ;;  %v3654_v41 = vmov 8   ;;  %v4234_v43 = vld [vmem:[#allocation2] sm:$0x77]  ;;  %v4249_v49 = vld [vmem:[#allocation2 + $0x18] sm:$0x77] }
 0x264   : > { %v3655_v42 = vmov 10   ;;  %v3656_v44 = vmov 11   ;;  %v3657_v57 = vmov 12   ;;  %v3658_v45 = vmov 9   ;;  %v4251_v50 = vld [vmem:[#allocation2 + $0x10] sm:$0x77] }
 0x265   : > { %v2360_v27 = vadd.f32 %v2359_v19, %v2357_v23  ;;  %v2375_v28 = vsub.s32 %v2372_v24, %v2374_v22  ;;  %v3659_v46 = vmov 21   ;;  %v3660_v47 = vmov 25  }
 0x266   : > { %v3661_v48 = vmov 14   ;;  %v3662_v51 = vmov 16   ;;  %v3663_v52 = vmov 13   ;;  %v3664_v54 = vmov 18  }
 0x267   : > { %v2376_v29 = vrot.slane %v2360_v27, %v2375_v28  ;;  %v3665_v55 = vmov 17   ;;  %v3666_v56 = vmov 29   ;;  %v3667_v58 = vmov 15  }
 0x268   : > { %v3668_v0 = vmov 19   ;;  %vm2909_vm0 = vcmask 518144  }
 0x269   : > { %v2384_v31 = vrot.slane %v2376_v29, %v2375_v28  ;;  %v2377_v32 = vcombine.high %v2376_v29, %v2376_v29 }
 0x26b   : > { %v4208_v26 = vrot.slane %v2384_v31, %v2394_v30  ;;  %v2391_v33 = vrot.slane %v2377_v32, %v2375_v28 }
 0x26d   : > { %2413 = vperm.xlu1 %3398, %v4208_v26   ;;  %2401 = vperm.xlu0 %3397, %v4208_v26   ;;  %v4214_v35 = vrot.slane %v2391_v33, %v2394_v30 }
 0x271   : > { %3400 = vset.pattern.permute.xlu1 %v3647_v53  ;;  %3399 = vset.pattern.permute.xlu0 %v3648_v34 }
 0x272   : > { %2448 = vperm.xlu1 %3400, %v4208_v26   ;;  %2433 = vperm.xlu0 %3399, %v4208_v26  }
 0x276   : > { %3402 = vset.pattern.permute.xlu1 %v3644_v15  ;;  %3401 = vset.pattern.permute.xlu0 %v3646_v25 }
 0x277   : > { %2417 = vperm.xlu1 %3402, %v4214_v35   ;;  %2405 = vperm.xlu0 %3401, %v4214_v35  }
 0x27b   : > { %3403 = vset.pattern.permute.xlu1 %v3648_v34  ;;  %3404 = vset.pattern.permute.xlu0 %v3647_v53 }
 0x27c   : > { %2437 = vperm.xlu1 %3403, %v4214_v35   ;;  %2452 = vperm.xlu0 %3404, %v4214_v35  }
 0x280   : > { %2455 = vrot.lane.b32.xlu1 %v4220_v36, %s3649_s28  ;;  %3406 = vset.pattern.permute.xlu0 %v3650_v37 }
 0x281   : > { %3405 = vset.pattern.permute.xlu1 %v3650_v37  ;;  %2468 = vperm.xlu0 %3406, %v4214_v35  }
 0x284   : > { %2464 = vperm.xlu1 %3405, %v4208_v26  }
 0x285   : > { %3408 = vset.pattern.permute.xlu0 %v3651_v38 }
 0x286   : > { %2496 = vperm.xlu0 %3408, %v4208_v26  }
 0x288   : > { %3407 = vset.pattern.permute.xlu1 %v3652_v39 }
 0x289   : > { %2476 = vperm.xlu1 %3407, %v4208_v26  }
 0x28a   : > { %3411 = vset.pattern.permute.xlu0 %v3653_v40 }
 0x28b   : > { %2515 = vperm.xlu0 %3411, %v4214_v35  }
 0x28d   : > { %2480 = vperm.xlu1 %3407, %v4214_v35  }
 0x28f   : > { %3413 = vset.pattern.permute.xlu0 %v3654_v41 }
 0x290   : > { %2531 = vperm.xlu0 %3413, %v4214_v35  }
 0x291   : > { %3409 = vset.pattern.permute.xlu1 %v3651_v38 }
 0x292   : > { %2500 = vperm.xlu1 %3409, %v4214_v35  }
 0x294   : > { %3415 = vset.pattern.permute.xlu0 %v3655_v42 }
 0x295   : > { %2559 = vperm.xlu0 %3415, %v4208_v26  }
 0x296   : > { %3410 = vset.pattern.permute.xlu1 %v3653_v40 }
 0x297   : > { %2511 = vperm.xlu1 %3410, %v4208_v26  }
 0x299   : > { %3418 = vset.pattern.permute.xlu0 %v3656_v44 }
 0x29a   : > { %2578 = vperm.xlu0 %3418, %v4214_v35  }
 0x29b   : > { %2518 = vrot.lane.b32.xlu1 %v4234_v43, %s3649_s28 }
 0x29c   : > { %3412 = vset.pattern.permute.xlu1 %v3654_v41  ;;  %v4326_v41 = vld [vmem:[#allocation2 + $0x8] sm:$0x77] }
 0x29e   : > { %3420 = vset.pattern.permute.xlu0 %v3657_v57 }
 0x29f   : > { %2527 = vperm.xlu1 %3412, %v4208_v26   ;;  %2594 = vperm.xlu0 %3420, %v4214_v35  }
 0x2a3   : > { %3414 = vset.pattern.permute.xlu1 %v3658_v45  ;;  %3423 = vset.pattern.permute.xlu0 %v3659_v46 }
 0x2a4   : > { %2539 = vperm.xlu1 %3414, %v4208_v26   ;;  %2728 = vperm.xlu0 %3423, %v4208_v26  }
 0x2a8   : > { %2543 = vperm.xlu1 %3414, %v4214_v35   ;;  %3426 = vset.pattern.permute.xlu0 %v3660_v47 }
 0x2a9   : > { %2795 = vperm.xlu0 %3426, %v4214_v35  }
 0x2ac   : > { %3416 = vset.pattern.permute.xlu1 %v3655_v42 }
 0x2ad   : > { %2563 = vperm.xlu1 %3416, %v4214_v35   ;;  %3427 = vset.pattern.permute.xlu0 %v3661_v48 }
 0x2ae   : > { %2622 = vperm.xlu0 %3427, %v4208_v26  }
 0x2b1   : > { %3417 = vset.pattern.permute.xlu1 %v3656_v44 }
 0x2b2   : > { %2574 = vperm.xlu1 %3417, %v4208_v26   ;;  %2626 = vperm.xlu0 %3427, %v4214_v35  }
 0x2b6   : > { %2581 = vrot.lane.b32.xlu1 %v4249_v49, %s3649_s28  ;;  %2644 = vrot.lane.b32.xlu0 %v4251_v50, %s3649_s28 }
 0x2b7   : > { %3419 = vset.pattern.permute.xlu1 %v3657_v57  ;;  %3431 = vset.pattern.permute.xlu0 %v3662_v51 }
 0x2ba   : > { %2590 = vperm.xlu1 %3419, %v4208_v26   ;;  %2657 = vperm.xlu0 %3431, %v4214_v35  }
 0x2be   : > { %3421 = vset.pattern.permute.xlu1 %v3663_v52  ;;  %3432 = vset.pattern.permute.xlu0 %v3664_v54 }
 0x2bf   : > { %2602 = vperm.xlu1 %3421, %v4208_v26  }
 0x2c3   : > { %2606 = vperm.xlu1 %3421, %v4214_v35  }
 0x2c7   : > { %3422 = vset.pattern.permute.xlu1 %v3665_v55 }
 0x2c8   : > { %2665 = vperm.xlu1 %3422, %v4208_v26  }
 0x2cc   : > { %2669 = vperm.xlu1 %3422, %v4214_v35  }
 0x2d0   : > { %3424 = vset.pattern.permute.xlu1 %v3659_v46 }
 0x2d1   : > { %2732 = vperm.xlu1 %3424, %v4214_v35  }
 0x2d5   : > { %3425 = vset.pattern.permute.xlu1 %v3660_v47  ;;  %v3669_v47 = vmov 22  }
 0x2d6   : > { %2791 = vperm.xlu1 %3425, %v4208_v26  }
 0x2da   : > { %3428 = vset.pattern.permute.xlu1 %v3666_v56 }
 0x2db   : > { %2854 = vperm.xlu1 %3428, %v4208_v26  }
 0x2df   : > { %2858 = vperm.xlu1 %3428, %v4214_v35  }
 0x2e3   : > { %3429 = vset.pattern.permute.xlu1 %v3667_v58  ;;  %v3670_v58 = vmov 24  }
 0x2e4   : > { %2637 = vperm.xlu1 %3429, %v4208_v26  }
 0x2e8   : > { %v2414_v59 = vpop.permute.xlu1 %2413  ;;  %2641 = vperm.xlu1 %3429, %v4214_v35   ;;  %v4275_v63 = vpop.permute.xlu0 %2401 }
 0x2e9   : > { %v2420_v60 = vmul.f32 %v2414_v59, %v4220_v36 }
 0x2eb   : > { %2424 = vrot.lane.b32.xlu0 %v2420_v60, %s3649_s28 }
 0x2ec   : > { %3430 = vset.pattern.permute.xlu1 %v3662_v51 }
 0x2ed   : > { %v4271_v61 = vpop.permute.xlu1 %2448  ;;  %2653 = vperm.xlu1 %3430, %v4208_v26   ;;  %v4279_v2 = vpop.permute.xlu0 %2433 }
 0x2f1   : > { %3433 = vset.pattern.permute.xlu1 %v3664_v54  ;;  %v4343_v54 = vld [vmem:[#allocation2 + $0x20] sm:$0x77] }
 0x2f2   : > { %v2418_v62 = vpop.permute.xlu1 %2417  ;;  %2689 = vperm.xlu1 %3433, %v4214_v35   ;;  %v4285_v5 = vpop.permute.xlu0 %2405 }
 0x2f3   : > { %v2421_v45 = vmul.f32 %v2418_v62, %v4220_v36 }
 0x2f6   : > { %3434 = vset.pattern.permute.xlu1 %v3668_v0 }
 0x2f7   : > { %v4277_v1 = vpop.permute.xlu1 %2437  ;;  %v4288_v8 = vpop.permute.xlu0 %2452 }
 0x2fb   : > { %v4281_v3 = vpop.permute.xlu1 %2455 }
 0x2fc   : > { %v4291_v10 = vpop.permute.xlu0 %2468 }
 0x2ff   : > { %v4283_v4 = vpop.permute.xlu1 %2464 }
 0x301   : > { %v4295_v12 = vpop.permute.xlu0 %2496 }
 0x304   : > { %v2477_v6 = vpop.permute.xlu1 %2476 }
 0x305   : > { %v2483_v7 = vmul.f32 %v2477_v6, %v4234_v43  ;;  %v3671_v6 = vmov 26  }
 0x306   : > { %v2516_v15 = vpop.permute.xlu0 %2515 }
 0x307   : > { %2487 = vrot.lane.b32.xlu0 %v2483_v7, %s3649_s28  ;;  %v2408_v7 = vmul.f32 %v4275_v63, %v4220_v36 }
 0x308   : > { %v2481_v9 = vpop.permute.xlu1 %2480 }
 0x309   : > { %v2484_v48 = vmul.f32 %v2481_v9, %v4234_v43  ;;  %v2441_v9 = vrot.slane %v4220_v36, 4 }
 0x30b   : > { %v4305_v23 = vpop.permute.xlu0 %2531 }
 0x30d   : > { %v4293_v11 = vpop.permute.xlu1 %2500 }
 0x310   : > { %v4309_v25 = vpop.permute.xlu0 %2559 }
 0x312   : > { %v2512_v13 = vpop.permute.xlu1 %2511 }
 0x315   : > { %v2579_v28 = vpop.permute.xlu0 %2578 }
 0x316   : > { %v2519_v14 = vpop.permute.xlu1 %2518 }
 0x317   : > { %v2520_v16 = vrot.slane %v2519_v14, 4  ;;  %v4362_v14 = vld [vmem:[#allocation2 + $0x28] sm:$0x77] }
 0x319   : > { %v4297_v17 = vmul.f32 %v2520_v16, %v2512_v13  ;;  %v4299_v18 = vmul.f32 %v2520_v16, %v2516_v15  ;;  %v2457_v13 = vrot.slane %v4281_v3, 4 }
 0x31a   : > { %v4301_v19 = vpop.permute.xlu1 %2527  ;;  %v4311_v31 = vpop.permute.xlu0 %2594 }
 0x31b   : > { %v2459_v63 = vmul.f32 %v2457_v13, %v4271_v61  ;;  %v4380_v61 = vld [vmem:[#allocation2 + $0x38] sm:$0x77] }
 0x31f   : > { %v2540_v20 = vpop.permute.xlu1 %2539  ;;  %v4319_v34 = vpop.permute.xlu0 %2728 }
 0x320   : > { %v2546_v21 = vmul.f32 %v2540_v20, %v4249_v49  ;;  %v2443_v20 = vmul.f32 %v2441_v9, %v4279_v2 }
 0x322   : > { %2550 = vrot.lane.b32.xlu0 %v2546_v21, %s3649_s28 }
 0x323   : > { %v2544_v22 = vpop.permute.xlu1 %2543 }
 0x324   : > { %v4323_v40 = vpop.permute.xlu0 %2795  ;;  %v2547_v52 = vmul.f32 %v2544_v22, %v4249_v49  ;;  %v3672_v22 = vmov 27  }
 0x328   : > { %v4307_v24 = vpop.permute.xlu1 %2563 }
 0x329   : > { %v4329_v57 = vpop.permute.xlu0 %2622 }
 0x32d   : > { %v2575_v27 = vpop.permute.xlu1 %2574  ;;  %v4337_v46 = vpop.permute.xlu0 %2626 }
 0x331   : > { %v2582_v29 = vpop.permute.xlu1 %2581  ;;  %v4345_v56 = vpop.permute.xlu0 %2644 }
 0x332   : > { %v2583_v30 = vrot.slane %v2582_v29, 4  ;;  %v2471_v29 = vmul.f32 %v4283_v4, %v4234_v43 }
 0x334   : > { %v4313_v32 = vmul.f32 %v2583_v30, %v2575_v27  ;;  %v4315_v33 = vmul.f32 %v2583_v30, %v2579_v28  ;;  %v3673_v30 = vmov 20  }
 0x335   : > { %v4317_v53 = vpop.permute.xlu1 %2590  ;;  %v4352_v62 = vpop.permute.xlu0 %2657 }
 0x33a   : > { %v2603_v37 = vpop.permute.xlu1 %2602 }
 0x33b   : > { %v2609_v38 = vmul.f32 %v2603_v37, %v4251_v50 }
 0x33d   : > { %2613 = vrot.lane.b32.xlu0 %v2609_v38, %s3649_s28  ;;  %v3674_v38 = vmov 30  }
 0x33e   : > { %v2607_v39 = vpop.permute.xlu1 %2606 }
 0x33f   : > { %v2610_v60 = vmul.f32 %v2607_v39, %v4251_v50 }
 0x341   : > { %2685 = vperm.xlu0 %3432, %v4208_v26  }
 0x343   : > { %v2666_v42 = vpop.permute.xlu1 %2665 }
 0x344   : > { %v2672_v44 = vmul.f32 %v2666_v42, %v4326_v41  ;;  %v3675_v42 = vmov 23  }
 0x345   : > { %3435 = vset.pattern.permute.xlu0 %v3668_v0 }
 0x346   : > { %2676 = vrot.lane.b32.xlu1 %v2672_v44, %s3649_s28  ;;  %2704 = vperm.xlu0 %3435, %v4214_v35   ;;  %v3676_v44 = vmov 31  }
 0x347   : > { %v2670_v51 = vpop.permute.xlu1 %2669 }
 0x348   : > { %v2673_v0 = vmul.f32 %v2670_v51, %v4326_v41  ;;  %v2735_v51 = vmul.f32 %v4319_v34, %v4343_v54  ;;  %v2799_v34 = vmul.f32 %v4323_v40, %v4362_v14 }
 0x34a   : > { %2426 = vrot.lane.b32.xlu1 %v2421_v45, %s3649_s28  ;;  %2707 = vrot.lane.b32.xlu0 %v4326_v41, %s3649_s28  ;;  %v2504_v45 = vrot.slane %v4234_v43, 4 }
 0x34b   : > { %3438 = vset.pattern.permute.xlu0 %v3669_v47 }
 0x34c   : > { %v2733_v55 = vpop.permute.xlu1 %2732 }
 0x34d   : > { %v2736_v59 = vmul.f32 %v2733_v55, %v4343_v54 }
 0x34e   : > { %2489 = vrot.lane.b32.xlu1 %v2484_v48, %s3649_s28  ;;  %2752 = vperm.xlu0 %3438, %v4214_v35   ;;  %v2506_v48 = vmul.f32 %v2504_v45, %v4295_v12  ;;  %v3677_v12 = vmov 28  }
 0x351   : > { %v2792_v16 = vpop.permute.xlu1 %2791 }
 0x352   : > { %2552 = vrot.lane.b32.xlu1 %v2547_v52, %s3649_s28  ;;  %3440 = vset.pattern.permute.xlu0 %v3670_v58  ;;  %v2798_v28 = vmul.f32 %v2792_v16, %v4362_v14 }
 0x353   : > { %2779 = vperm.xlu0 %3440, %v4208_v26  }
 0x356   : > { %2615 = vrot.lane.b32.xlu1 %v2610_v60, %s3649_s28  ;;  %v2855_v39 = vpop.permute.xlu1 %2854 }
 0x357   : > { %2741 = vrot.lane.b32.xlu0 %v2736_v59, %s3649_s28  ;;  %v2861_v4 = vmul.f32 %v2855_v39, %v4380_v61  ;;  %v2534_v59 = vmul.f32 %v4301_v19, %v4249_v49  ;;  %v2567_v19 = vrot.slane %v4249_v49, 4 }
 0x358   : > { %3442 = vset.pattern.permute.xlu0 %v3671_v6 }
 0x35a   : > { %2678 = vrot.lane.b32.xlu1 %v2673_v0, %s3649_s28  ;;  %v2569_v0 = vmul.f32 %v2567_v19, %v4309_v25 }
 0x35b   : > { %2811 = vperm.xlu0 %3442, %v4208_v26  }
 0x35d   : > { %v2425_v15 = vpop.permute.xlu0 %2424 }
 0x35e   : > { %v2430_v21 = vadd.f32 %v2425_v15, %v2408_v7  ;;  %2700 = vperm.xlu1 %3434, %v4208_v26   ;;  %v2597_v15 = vmul.f32 %v4317_v53, %v4251_v50  ;;  %v2630_v53 = vrot.slane %v4251_v50, 4 }
 0x35f   : > { %3445 = vset.pattern.permute.xlu0 %v3672_v22 }
 0x360   : > { %v2445_v27 = vadd.f32 %v2443_v20, %v2430_v21  ;;  %2830 = vperm.xlu0 %3445, %v4214_v35   ;;  %v2859_v20 = vpop.permute.xlu1 %2858 }
 0x361   : > { %v2862_v25 = vmul.f32 %v2859_v20, %v4380_v61 }
 0x362   : > { %3436 = vset.pattern.permute.xlu1 %v3673_v30  ;;  %v2461_v2 = vadd.f32 %v2459_v63, %v2445_v27  ;;  %v2646_v27 = vrot.slane %v4345_v56, 4 }
 0x363   : > { %2716 = vperm.xlu1 %3436, %v4208_v26  }
 0x364   : > { %v2473_v37 = vadd.f32 %v2471_v29, %v2461_v2  ;;  %2802 = vrot.lane.b32.xlu0 %v2798_v28, %s3649_s28  ;;  %v2638_v40 = vpop.permute.xlu1 %2637 }
 0x365   : > { %3448 = vset.pattern.permute.xlu0 %v3674_v38  ;;  %v2648_v30 = vmul.f32 %v2646_v27, %v2638_v40 }
 0x367   : > { %2720 = vperm.xlu1 %3436, %v4214_v35  }
 0x368   : > { %2833 = vrot.lane.b32.xlu0 %v4362_v14, %s3649_s28 }
 0x36b   : > { %3437 = vset.pattern.permute.xlu1 %v3669_v47 }
 0x36c   : > { %2748 = vperm.xlu1 %3437, %v4208_v26   ;;  %2878 = vperm.xlu0 %3448, %v4214_v35  }
 0x370   : > { %3439 = vset.pattern.permute.xlu1 %v3675_v42  ;;  %2865 = vrot.lane.b32.xlu0 %v2861_v4, %s3649_s28  ;;  %v2693_v4 = vrot.slane %v4326_v41, 4  ;;  %v2409_v42 = vmul.f32 %v4285_v5, %v4220_v36  ;;  %v2507_v36 = vmul.f32 %v2504_v45, %v4293_v11  ;;  %v2633_v45 = vmul.f32 %v2630_v53, %v4337_v46 }
 0x371   : > { %2763 = vperm.xlu1 %3439, %v4208_v26   ;;  %3450 = vset.pattern.permute.xlu0 %v3676_v44 }
 0x374   : > { %2896 = vrot.lane.b32.xlu0 %v4380_v61, %s3649_s28 }
 0x375   : > { %2767 = vperm.xlu1 %3439, %v4214_v35  }
 0x379   : > { %3441 = vset.pattern.permute.xlu1 %v3670_v58  ;;  %v2488_v47 = vpop.permute.xlu0 %2487 }
 0x37a   : > { %v2493_v52 = vadd.f32 %v2488_v47, %v2473_v37  ;;  %2783 = vperm.xlu1 %3441, %v4214_v35  }
 0x37c   : > { %v2508_v55 = vadd.f32 %v2506_v48, %v2493_v52  ;;  %v2460_v52 = vmul.f32 %v2457_v13, %v4288_v8  ;;  %v2570_v13 = vmul.f32 %v2567_v19, %v4307_v24 }
 0x37e   : > { %2739 = vrot.lane.b32.xlu1 %v2735_v51, %s3649_s28  ;;  %v2524_v60 = vadd.f32 %v4297_v17, %v2508_v55 }
 0x37f   : > { %3443 = vset.pattern.permute.xlu1 %v3671_v6 }
 0x380   : > { %v2536_v58 = vadd.f32 %v2534_v59, %v2524_v60  ;;  %v2472_v60 = vmul.f32 %v4291_v10, %v4234_v43 }
 0x382   : > { %2770 = vrot.lane.b32.xlu1 %v4343_v54, %s3649_s28 }
 0x386   : > { %2815 = vperm.xlu1 %3443, %v4214_v35  }
 0x38a   : > { %3444 = vset.pattern.permute.xlu1 %v3672_v22  ;;  %v2642_v22 = vpop.permute.xlu1 %2641 }
 0x38b   : > { %2826 = vperm.xlu1 %3444, %v4208_v26  }
 0x38e   : > { %v2654_v63 = vpop.permute.xlu1 %2653 }
 0x38f   : > { %3446 = vset.pattern.permute.xlu1 %v3677_v12 }
 0x390   : > { %2842 = vperm.xlu1 %3446, %v4208_v26  }
 0x392   : > { %v2690_v37 = vpop.permute.xlu1 %2689 }
 0x393   : > { %v2696_v40 = vmul.f32 %v2693_v4, %v2690_v37 }
 0x394   : > { %2846 = vperm.xlu1 %3446, %v4214_v35   ;;  %v2551_v17 = vpop.permute.xlu0 %2550 }
 0x395   : > { %v2556_v6 = vadd.f32 %v2551_v17, %v2536_v58 }
 0x397   : > { %v2571_v7 = vadd.f32 %v2569_v0, %v2556_v6 }
 0x398   : > { %2804 = vrot.lane.b32.xlu1 %v2799_v34, %s3649_s28  ;;  %v2535_v34 = vmul.f32 %v4305_v23, %v4249_v49  ;;  %v2661_v49 = vmul.f32 %v4352_v62, %v4326_v41 }
 0x399   : > { %3447 = vset.pattern.permute.xlu1 %v3674_v38  ;;  %v2587_v16 = vadd.f32 %v4313_v32, %v2571_v7  ;;  %v2632_v32 = vmul.f32 %v2630_v53, %v4329_v57  ;;  %v2444_v57 = vmul.f32 %v2441_v9, %v4277_v1  ;;  %v2598_v7 = vmul.f32 %v4311_v31, %v4251_v50 }
 0x39b   : > { %v2599_v21 = vadd.f32 %v2597_v15, %v2587_v16 }
 0x39c   : > { %2874 = vperm.xlu1 %3447, %v4208_v26  }
 0x3a0   : > { %3449 = vset.pattern.permute.xlu1 %v3676_v44 }
 0x3a1   : > { %2889 = vperm.xlu1 %3449, %v4208_v26   ;;  %v2660_v26 = vmul.f32 %v2654_v63, %v4326_v41 }
 0x3a5   : > { %2893 = vperm.xlu1 %3449, %v4214_v35  }
 0x3a9   : > { %2867 = vrot.lane.b32.xlu1 %v2862_v25, %s3649_s28 }
 0x3af   : > { %v2614_v28 = vpop.permute.xlu0 %2613 }
 0x3b0   : > { %v2619_v29 = vadd.f32 %v2614_v28, %v2599_v21 }
 0x3b2   : > { %v2634_v2 = vadd.f32 %v2632_v32, %v2619_v29 }
 0x3b4   : > { %v2650_v38 = vadd.f32 %v2648_v30, %v2634_v2 }
 0x3b6   : > { %v2662_v39 = vadd.f32 %v2660_v26, %v2650_v38 }
 0x3b8   : > { %v2677_v35 = vpop.permute.xlu1 %2676 }
 0x3b9   : > { %v2682_v56 = vadd.f32 %v2677_v35, %v2662_v39  ;;  %v2756_v39 = vrot.slane %v4343_v54, 4 }
 0x3bc   : > { %v2427_v44 = vpop.permute.xlu1 %2426  ;;  %v2686_v47 = vpop.permute.xlu0 %2685 }
 0x3bd   : > { %v2431_v48 = vadd.f32 %v2427_v44, %v2409_v42  ;;  %v2695_v51 = vmul.f32 %v2693_v4, %v2686_v47 }
 0x3bf   : > { %v2446_v55 = vadd.f32 %v2444_v57, %v2431_v48  ;;  %v2697_v59 = vadd.f32 %v2695_v51, %v2682_v56 }
 0x3c0   : > { %v2490_v5 = vpop.permute.xlu1 %2489 }
 0x3c1   : > { %v2462_v58 = vadd.f32 %v2460_v52, %v2446_v55  ;;  %v2705_v21 = vpop.permute.xlu0 %2704 }
 0x3c3   : > { %v2474_v12 = vadd.f32 %v2472_v60, %v2462_v58 }
 0x3c4   : > { %v2553_v17 = vpop.permute.xlu1 %2552 }
 0x3c5   : > { %v2494_v1 = vadd.f32 %v2490_v5, %v2474_v12  ;;  %v2708_v31 = vpop.permute.xlu0 %2707 }
 0x3c6   : > { %v2709_v2 = vrot.slane %v2708_v31, 4 }
 0x3c7   : > { %v2509_v9 = vadd.f32 %v2507_v36, %v2494_v1 }
 0x3c8   : > { %v2616_v6 = vpop.permute.xlu1 %2615  ;;  %v2712_v47 = vmul.f32 %v2709_v2, %v2705_v21 }
 0x3c9   : > { %v2525_v3 = vadd.f32 %v4299_v18, %v2509_v9  ;;  %v2649_v18 = vmul.f32 %v2646_v27, %v2642_v22  ;;  %v2753_v32 = vpop.permute.xlu0 %2752 }
 0x3ca   : > { %v2759_v9 = vmul.f32 %v2756_v39, %v2753_v32 }
 0x3cb   : > { %v2537_v8 = vadd.f32 %v2535_v34, %v2525_v3 }
 0x3cc   : > { %v2679_v16 = vpop.permute.xlu1 %2678 }
 0x3cd   : > { %v2557_v0 = vadd.f32 %v2553_v17, %v2537_v8  ;;  %v2819_v17 = vrot.slane %v4362_v14, 4 }
 0x3ce   : > { %v2780_v46 = vpop.permute.xlu0 %2779 }
 0x3cf   : > { %v2572_v10 = vadd.f32 %v2570_v13, %v2557_v0  ;;  %v2786_v60 = vmul.f32 %v2780_v46, %v4362_v14 }
 0x3d1   : > { %v2588_v43 = vadd.f32 %v4315_v33, %v2572_v10 }
 0x3d2   : > { %v2742_v30 = vpop.permute.xlu0 %2741 }
 0x3d3   : > { %v2600_v11 = vadd.f32 %v2598_v7, %v2588_v43 }
 0x3d5   : > { %v2620_v15 = vadd.f32 %v2616_v6, %v2600_v11 }
 0x3d6   : > { %v2812_v62 = vpop.permute.xlu0 %2811 }
 0x3d7   : > { %v2635_v23 = vadd.f32 %v2633_v45, %v2620_v15  ;;  %v2821_v13 = vmul.f32 %v2819_v17, %v2812_v62 }
 0x3d9   : > { %v2651_v20 = vadd.f32 %v2649_v18, %v2635_v23  ;;  %v2701_v24 = vpop.permute.xlu1 %2700 }
 0x3da   : > { %v2711_v22 = vmul.f32 %v2709_v2, %v2701_v24 }
 0x3db   : > { %v2663_v19 = vadd.f32 %v2661_v49, %v2651_v20  ;;  %v2831_v37 = vpop.permute.xlu0 %2830  ;;  %v2882_v20 = vrot.slane %v4380_v61, 4 }
 0x3dc   : > { %v2713_v38 = vadd.f32 %v2711_v22, %v2697_v59 }
 0x3dd   : > { %v2683_v25 = vadd.f32 %v2679_v16, %v2663_v19 }
 0x3de   : > { %v2717_v63 = vpop.permute.xlu1 %2716 }
 0x3df   : > { %v2698_v50 = vadd.f32 %v2696_v40, %v2683_v25  ;;  %v2723_v27 = vmul.f32 %v2717_v63, %v4343_v54  ;;  %v2803_v51 = vpop.permute.xlu0 %2802 }
 0x3e1   : > { %v2725_v35 = vadd.f32 %v2723_v27, %v2713_v38  ;;  %v2714_v58 = vadd.f32 %v2712_v47, %v2698_v50 }
 0x3e2   : > { %v2721_v33 = vpop.permute.xlu1 %2720 }
 0x3e3   : > { %v2724_v52 = vmul.f32 %v2721_v33, %v4343_v54  ;;  %v2834_v36 = vpop.permute.xlu0 %2833 }
 0x3e4   : > { %v2835_v6 = vrot.slane %v2834_v36, 4 }
 0x3e5   : > { %v2726_v12 = vadd.f32 %v2724_v52, %v2714_v58 }
 0x3e6   : > { %v2838_v46 = vmul.f32 %v2835_v6, %v2831_v37 }
 0x3e7   : > { %v2749_v28 = vpop.permute.xlu1 %2748  ;;  %v2746_v34 = vadd.f32 %v2742_v30, %v2726_v12  ;;  %v2879_v8 = vpop.permute.xlu0 %2878 }
 0x3e8   : > { %v2758_v57 = vmul.f32 %v2756_v39, %v2749_v28  ;;  %v2885_v38 = vmul.f32 %v2882_v20, %v2879_v8 }
 0x3e9   : > { %v2761_v54 = vadd.f32 %v2759_v9, %v2746_v34 }
 0x3eb   : > { %v2866_v15 = vpop.permute.xlu0 %2865 }
 0x3ec   : > { %v2764_v53 = vpop.permute.xlu1 %2763 }
 0x3ef   : > { %v2897_v19 = vpop.permute.xlu0 %2896 }
 0x3f0   : > { %v2768_v29 = vpop.permute.xlu1 %2767  ;;  %v2898_v31 = vrot.slane %v2897_v19, 4 }
 0x3f5   : > { %v2784_v41 = vpop.permute.xlu1 %2783 }
 0x3f6   : > { %v2787_v16 = vmul.f32 %v2784_v41, %v4362_v14 }
 0x3f9   : > { %v2740_v26 = vpop.permute.xlu1 %2739 }
 0x3fa   : > { %v2745_v44 = vadd.f32 %v2740_v26, %v2725_v35 }
 0x3fc   : > { %v2760_v55 = vadd.f32 %v2758_v57, %v2745_v44 }
 0x3fd   : > { %v2771_v4 = vpop.permute.xlu1 %2770 }
 0x3fe   : > { %v2772_v42 = vrot.slane %v2771_v4, 4 }
 0x400   : > { %v2774_v56 = vmul.f32 %v2772_v42, %v2764_v53  ;;  %v2775_v0 = vmul.f32 %v2772_v42, %v2768_v29  ;;  %v2904_v29 = vld [vmem:[#allocation9] sm:$0x7] }
 0x401   : > { %v2816_v48 = vpop.permute.xlu1 %2815 }
 0x402   : > { %v2776_v5 = vadd.f32 %v2774_v56, %v2760_v55  ;;  %v2777_v45 = vadd.f32 %v2775_v0, %v2761_v54  ;;  %v2822_v63 = vmul.f32 %v2819_v17, %v2816_v48 }
 0x404   : > { %v2788_v1 = vadd.f32 %v2786_v60, %v2776_v5  ;;  %v2789_v24 = vadd.f32 %v2787_v16, %v2777_v45 }
 0x406   : > { %v2827_v59 = vpop.permute.xlu1 %2826  ;;  %v2808_v10 = vadd.f32 %v2803_v51, %v2788_v1 }
 0x407   : > { %v2837_v11 = vmul.f32 %v2835_v6, %v2827_v59 }
 0x408   : > { %v2823_v43 = vadd.f32 %v2821_v13, %v2808_v10 }
 0x40a   : > { %v2839_v23 = vadd.f32 %v2837_v11, %v2823_v43 }
 0x40b   : > { %v2843_v3 = vpop.permute.xlu1 %2842 }
 0x40c   : > { %v2849_v49 = vmul.f32 %v2843_v3, %v4380_v61 }
 0x40e   : > { %v2851_v21 = vadd.f32 %v2849_v49, %v2839_v23 }
 0x40f   : > { %v2847_v7 = vpop.permute.xlu1 %2846 }
 0x410   : > { %v2871_v33 = vadd.f32 %v2866_v15, %v2851_v21  ;;  %v2850_v62 = vmul.f32 %v2847_v7, %v4380_v61 }
 0x413   : > { %v2805_v18 = vpop.permute.xlu1 %2804 }
 0x414   : > { %v2809_v40 = vadd.f32 %v2805_v18, %v2789_v24 }
 0x416   : > { %v2824_v32 = vadd.f32 %v2822_v63, %v2809_v40 }
 0x417   : > { %v2875_v25 = vpop.permute.xlu1 %2874 }
 0x418   : > { %v2884_v50 = vmul.f32 %v2882_v20, %v2875_v25  ;;  %v2840_v2 = vadd.f32 %v2838_v46, %v2824_v32 }
 0x41a   : > { %v2886_v53 = vadd.f32 %v2884_v50, %v2871_v33  ;;  %v2852_v27 = vadd.f32 %v2850_v62, %v2840_v2 }
 0x41c   : > { %v2890_v28 = vpop.permute.xlu1 %2889 }
 0x41d   : > { %v2900_v14 = vmul.f32 %v2898_v31, %v2890_v28 }
 0x41f   : > { %v2902_v30 = vadd.f32 %v2900_v14, %v2886_v53 }
 0x420   : > { %v2894_v41 = vpop.permute.xlu1 %2893 }
 0x421   : > { %v2905_v22 = vadd.f32 %v2904_v29, %v2902_v30  ;;  %v2901_v35 = vmul.f32 %v2898_v31, %v2894_v41 }
 0x423   : > { %3451 = vtanh.f32 %v2905_v22 }
 0x424   : > { %v2868_v26 = vpop.permute.xlu1 %2867 }
 0x425   : > { %v2872_v39 = vadd.f32 %v2868_v26, %v2852_v27 }
 0x427   : > { %v2887_v4 = vadd.f32 %v2885_v38, %v2872_v39 }
 0x429   : > { %v2903_v42 = vadd.f32 %v2901_v35, %v2887_v4 }
 0x42b   : > { %v2906_v44 = vadd.f32 %v2904_v29, %v2903_v42 }
 0x42d   : > { %3453 = vtanh.f32 %v2906_v44 }
 0x430   : > { %v3452_v37 = vpop.eup %3451 }
 0x431   : > { %2910 = vst.msk [vmem:[%s4483_s7] sm:$0x7] %vm2909_vm0, %v3452_v37 }
 0x43a   : > { %v3454_v47 = vpop.eup %3453 }
 0x43b   : > { %2911 = vst.msk [vmem:[%s4483_s7 + $0x4] sm:$0x7] %vm2909_vm0, %v3454_v47 }
 0x43c PF: > { %p16_p7 = scmp.ge.s32.totalorder %s3740_s29, 4   ;;  %s4503_s24 = smov %s3627_s25 }
 0x43d   : > { %s4504_s25 = smov %s3631_s26  ;;  %s4505_s26 = smov %s3750_s9 }
 0x43e   : > { %s4506_s27 = smov %s3740_s29  ;;  %18 = sbr.rel (!%p16_p7) target bundleno = 3 (0x3), region = 118 }
 0x443   :  { %2923 = vsyncpa [#allocation4], 1 }
 0x444   :  { %2925 = vsyncpa [#allocation4 + $0x1], 1 }
 0x445   :  { %2926 = vsyncpa [#allocation6], 1 }

</bundles_post_ra>
